<compile_context>
chip_gen: v7x
topology: tpu7x:2x2x1
jax: 0.10.0
libtpu: 0.0.40
codegen_flags: <defaults>
</compile_context>

<pallas_src>
import jax
import jax.numpy as jnp
from jax.experimental import pallas as pl
from jax.experimental.pallas import tpu as pltpu

FC_FEATURES = 2048  # fixed by Resnet101.__init__ (fc_features=2048)


def _resnet101_head_kernel(x_ref, w_ref, b_ref, o_ref, acc_ref):
    # x_ref: (Nblk, Cblk, HW)  backbone features, native NCHW (HW on lanes)
    # w_ref: (Cblk, NCpad)     fc weight slab, transposed + pre-scaled by 1/HW
    # b_ref: (1, NCpad)        fc bias (zero-padded)
    # o_ref: (Nblk, NCpad)     logits (padded)
    # acc_ref: VMEM f32 accumulator, resident across the C-reduction axis.
    k = pl.program_id(1)

    @pl.when(k == 0)
    def _init():
        acc_ref[...] = jnp.zeros_like(acc_ref)

    # AdaptiveAvgPool2d((1,1)) == mean over H*W; the 1/HW scale is folded into
    # the weight, so a plain sum (XLU lane reduction) suffices here.
    pooled = jnp.sum(x_ref[...], axis=-1)                        # (Nblk, Cblk)
    acc_ref[...] += jnp.dot(pooled, w_ref[...],
                            preferred_element_type=jnp.float32)  # MXU

    @pl.when(k == pl.num_programs(1) - 1)
    def _finalize():
        o_ref[...] = acc_ref[...] + b_ref[...]


def _pick_nblk(n):
    # Output block's second-to-last dim must be a multiple of 8 or equal the
    # full batch.  Small batches use a single block; large batches tile so the
    # "parallel" batch axis can shard across TensorCores.
    if n <= 128:
        return n
    for cand in (128, 64, 32, 16, 8):
        if n % cand == 0:
            return cand
    return n  # fallback: whole batch in one block


def _pick_cblk(c, nblk, hw, budget_bytes=8 * 1024 * 1024):
    # Largest channel tile (capped at 512, so the reduction axis still
    # pipelines) whose f32 feature slab stays under a single-buffer VMEM
    # budget -- the pipeline double-buffers it, so this keeps well clear of
    # v7x's 64 MiB physical / 32 MiB default scoped VMEM.
    cblk = min(c, 512)
    while cblk > 8 and nblk * cblk * hw * 4 > budget_bytes:
        cblk //= 2
    while cblk > 1 and c % cblk != 0:
        cblk //= 2
    return max(cblk, 1)


def resnet101_head(feat_nchw, fc_weight, fc_bias):
    """feat_nchw: (N, 2048, H, W) f32 backbone feature map (NCHW, torch layout)
    fc_weight:  (num_classes, 2048) f32 (torch nn.Linear weight layout)
    fc_bias:    (num_classes,) f32
    returns:    (N, num_classes) f32 logits
    """
    n, c, h, w = feat_nchw.shape
    assert c == FC_FEATURES, f"expected {FC_FEATURES} channels, got {c}"
    num_classes = fc_weight.shape[0]
    hw = h * w
    ncpad = ((num_classes + 127) // 128) * 128   # lane-dense class dim

    # Free view: NCHW -> (N, C, H*W).  No HBM transpose pass.
    x = feat_nchw.reshape(n, c, hw).astype(jnp.float32)

    # Transpose torch weight to (C, NC), fold in the 1/HW mean scale, and
    # zero-pad classes to a multiple of 128 (padded logits are sliced off).
    w_t = jnp.asarray(fc_weight, jnp.float32).T * (1.0 / float(hw))
    w_t = jnp.pad(w_t, ((0, 0), (0, ncpad - num_classes)))       # (C, NCpad)
    b = jnp.pad(jnp.asarray(fc_bias, jnp.float32),
                (0, ncpad - num_classes)).reshape(1, ncpad)      # (1, NCpad)

    nblk = _pick_nblk(n)
    cblk = _pick_cblk(c, nblk, hw)
    grid = (n // nblk, c // cblk)

    logits_padded = pl.pallas_call(
        _resnet101_head_kernel,
        out_shape=jax.ShapeDtypeStruct((n, ncpad), jnp.float32),
        grid_spec=pltpu.PrefetchScalarGridSpec(
            num_scalar_prefetch=0,
            grid=grid,
            in_specs=[
                pl.BlockSpec((nblk, cblk, hw), lambda i, k: (i, k, 0)),
                pl.BlockSpec((cblk, ncpad), lambda i, k: (k, 0)),
                pl.BlockSpec((1, ncpad), lambda i, k: (0, 0)),
            ],
            out_specs=pl.BlockSpec((nblk, ncpad), lambda i, k: (i, 0)),
            scratch_shapes=[pltpu.VMEM((nblk, ncpad), jnp.float32)],
        ),
        compiler_params=pltpu.CompilerParams(
            dimension_semantics=("parallel", "arbitrary"),
        ),
        cost_estimate=pl.CostEstimate(
            flops=2 * n * c * ncpad + n * c * hw,
            transcendentals=0,
            bytes_accessed=4 * (n * c * hw + c * ncpad + ncpad + n * ncpad),
        ),
    )(x, w_t, b)

    return logits_padded[:, :num_classes]


def _reference_head(feat_nchw, fc_weight, fc_bias):
    # Pure-JAX reference of torch semantics:
    # AdaptiveAvgPool2d((1,1)) -> flatten(1) -> Linear
    pooled = jnp.mean(feat_nchw, axis=(2, 3))          # (N, C)
    return pooled @ fc_weight.T + fc_bias              # (N, num_classes)


if __name__ == "__main__":
    key = jax.random.PRNGKey(0)
    k_x, k_w, k_b = jax.random.split(key, 3)

    # Small shapes consistent with the module: batch=2, C must equal 2048
    # (hard-wired fc_features), spatial = 7x7 (ResNet101 final feature map).
    N, C, H, W = 2, FC_FEATURES, 7, 7
    NUM_CLASSES = 16

    feats = jax.random.normal(k_x, (N, C, H, W), dtype=jnp.float32)

    # Deterministic synthetic fc parameters (torch nn.Linear shapes).
    fc_weight = 0.02 * jax.random.normal(k_w, (NUM_CLASSES, C), dtype=jnp.float32)
    fc_bias = 0.1 * jax.random.normal(k_b, (NUM_CLASSES,), dtype=jnp.float32)

    out = resnet101_head(feats, fc_weight, fc_bias)
    out = jax.block_until_ready(out)

    ref = _reference_head(feats, fc_weight, fc_bias)
    assert out.shape == (N, NUM_CLASSES)
    assert jnp.allclose(out, ref, atol=1e-3, rtol=1e-4), "mismatch vs reference"

    print("KERNEL_OK")
</pallas_src>

<mosaic_0001>
module attributes {stable_mosaic.version = 11 : i64} {
  func.func @_resnet101_head_kernel(%arg0: i32, %arg1: i32, %arg2: memref<2x512x49xf32, #tpu.memory_space<vmem>>, %arg3: memref<512x128xf32, #tpu.memory_space<vmem>>, %arg4: memref<1x128xf32, #tpu.memory_space<vmem>>, %arg5: memref<2x128xf32, #tpu.memory_space<vmem>>, %arg6: memref<2x128xf32, #tpu.memory_space<vmem>>) attributes {dimension_semantics = [#tpu.dimension_semantics<parallel>, #tpu.dimension_semantics<arbitrary>], iteration_bounds = array<i64: 1, 4>, scalar_prefetch = 0 : i64, scratch_operands = 1 : i64, tpu.core_type = #tpu.core_type<tc>, window_params = [{transform_indices = @transform_0, window_bounds = array<i64: 2, 512, 49>}, {transform_indices = @transform_1, window_bounds = array<i64: 512, 128>}, {pipeline_mode = #tpu.pipeline_mode<synchronous>, transform_indices = @transform_2, window_bounds = array<i64: 1, 128>}, {transform_indices = @transform_3, window_bounds = array<i64: 2, 128>}]} {
    %c0_i32 = arith.constant 0 : i32
    %0 = arith.cmpi eq, %arg1, %c0_i32 : i32
    %1 = arith.extui %0 : i1 to i32
    %c0_i32_0 = arith.constant 0 : i32
    %2 = arith.cmpi ne, %1, %c0_i32_0 : i32
    scf.if %2 {
      %cst_11 = arith.constant 0.000000e+00 : f32
      %13 = vector.broadcast %cst_11 : f32 to vector<2x128xf32>
      %c0_12 = arith.constant 0 : index
      %c0_13 = arith.constant 0 : index
      %14 = vector.load %arg6[%c0_12, %c0_13] : memref<2x128xf32, #tpu.memory_space<vmem>>, vector<2x128xf32>
      tpu.vector_store %arg6[%c0_12, %c0_13], %13 {strides = array<i32>} : memref<2x128xf32, #tpu.memory_space<vmem>>, vector<2x128xf32>,
    } else {
    }
    %c0 = arith.constant 0 : index
    %c0_1 = arith.constant 0 : index
    %c0_2 = arith.constant 0 : index
    %3 = vector.load %arg2[%c0, %c0_1, %c0_2] : memref<2x512x49xf32, #tpu.memory_space<vmem>>, vector<2x512x49xf32>
    %cst = arith.constant dense<0.000000e+00> : vector<2x512xf32>
    %4 = vector.multi_reduction <add>, %3, %cst [2] : vector<2x512x49xf32> to vector<2x512xf32>
    %c0_3 = arith.constant 0 : index
    %c0_4 = arith.constant 0 : index
    %5 = vector.load %arg6[%c0_3, %c0_4] : memref<2x128xf32, #tpu.memory_space<vmem>>, vector<2x128xf32>
    %c0_5 = arith.constant 0 : index
    %c0_6 = arith.constant 0 : index
    %6 = vector.load %arg3[%c0_5, %c0_6] : memref<512x128xf32, #tpu.memory_space<vmem>>, vector<512x128xf32>
    %cst_7 = arith.constant dense<0.000000e+00> : vector<2x128xf32>
    %7 = tpu.matmul %4, %6, %cst_7 {dimension_numbers = #tpu.dot_dimension_numbers<[1], [0], [0], [1], [0, 0, 1, 1], [], []>} : vector<2x512xf32>, vector<512x128xf32>, vector<2x128xf32> -> vector<2x128xf32>
    %8 = arith.addf %5, %7 : vector<2x128xf32>
    %c0_8 = arith.constant 0 : index
    %c0_9 = arith.constant 0 : index
    %9 = vector.load %arg6[%c0_8, %c0_9] : memref<2x128xf32, #tpu.memory_space<vmem>>, vector<2x128xf32>
    tpu.vector_store %arg6[%c0_8, %c0_9], %8 {strides = array<i32>} : memref<2x128xf32, #tpu.memory_space<vmem>>, vector<2x128xf32>,
    %c3_i32 = arith.constant 3 : i32
    %10 = arith.cmpi eq, %arg1, %c3_i32 : i32
    %11 = arith.extui %10 : i1 to i32
    %c0_i32_10 = arith.constant 0 : i32
    %12 = arith.cmpi ne, %11, %c0_i32_10 : i32
    scf.if %12 {
      %c0_11 = arith.constant 0 : index
      %c0_12 = arith.constant 0 : index
      %13 = vector.load %arg6[%c0_11, %c0_12] : memref<2x128xf32, #tpu.memory_space<vmem>>, vector<2x128xf32>
      %c0_13 = arith.constant 0 : index
      %c0_14 = arith.constant 0 : index
      %14 = vector.load %arg4[%c0_13, %c0_14] : memref<1x128xf32, #tpu.memory_space<vmem>>, vector<1x128xf32>
      %15 = vector.broadcast %14 : vector<1x128xf32> to vector<2x128xf32>
      %16 = arith.addf %13, %15 : vector<2x128xf32>
      %c0_15 = arith.constant 0 : index
      %c0_16 = arith.constant 0 : index
      %17 = vector.load %arg5[%c0_15, %c0_16] : memref<2x128xf32, #tpu.memory_space<vmem>>, vector<2x128xf32>
      tpu.vector_store %arg5[%c0_15, %c0_16], %16 {strides = array<i32>} : memref<2x128xf32, #tpu.memory_space<vmem>>, vector<2x128xf32>,
    } else {
    }
    return
  }
  func.func @transform_0(%arg0: i32, %arg1: i32) -> (i32, i32, i32) {
    %c0_i32 = arith.constant 0 : i32
    %c0_i32_0 = arith.constant 0 : i32
    return %arg0, %arg1, %c0_i32 : i32, i32, i32
  }
  func.func @transform_1(%arg0: i32, %arg1: i32) -> (i32, i32) {
    %c0_i32 = arith.constant 0 : i32
    %c0_i32_0 = arith.constant 0 : i32
    return %arg1, %c0_i32 : i32, i32
  }
  func.func @transform_2(%arg0: i32, %arg1: i32) -> (i32, i32) {
    %c0_i32 = arith.constant 0 : i32
    %c0_i32_0 = arith.constant 0 : i32
    %c0_i32_1 = arith.constant 0 : i32
    return %c0_i32, %c0_i32_0 : i32, i32
  }
  func.func @transform_3(%arg0: i32, %arg1: i32) -> (i32, i32) {
    %c0_i32 = arith.constant 0 : i32
    %c0_i32_0 = arith.constant 0 : i32
    return %arg0, %c0_i32 : i32, i32
  }
}

</mosaic_0001>

<bundles_post_ra>
// kernel: tpu_custom_call.1
= control target key start
LH: loop header
LB: loop body
LE: loop exit
PB: predicated region body
PF: predicated region fallthrough
CT: control target
= control target key end

     0   :  { %8 = vsyncpa [#allocation5], 0  ;;  %s2658_s12 = smov 0   ;;  %s2660_s13 = smov 0   ;;  %s3794_s0 = inlined_call_operand.vmem [shape: f32[2,2048,49], index: 0, kind: input, shape index: {}]   ;;  %s3795_s1 = inlined_call_operand.vmem [shape: f32[2048,128], index: 1, kind: input, shape index: {}]   ;;  %s3796_s2 = inlined_call_operand.vmem [shape: f32[1,128], index: 2, kind: input, shape index: {}]   ;;  %s3797_s3 = inlined_call_operand.hbm [shape: f32[2,128], index: 3, kind: output, shape index: {}]  }
   0x1   :  { %s2662_s14 = smov 0   ;;  %s2664_s15 = smov 0  }
   0x2   :  { %s2666_s16 = smov 0  }
   0x3 LB: > { %s2366_s17 = sadd.s32 4294967295, %s2634_s16   ;;  %s23_s18 = sadd.s32 1, %s2630_s15  ;;  %s2634_s16 = sphi %s2666_s16, %s14_s16   ;;  %s2630_s15 = sphi %s2664_s15, %s3802_s15   ;;  %s2626_s14 = sphi %s2662_s14, %s3801_s14   ;;  %s2622_s13 = sphi %s2660_s13, %s3800_s13   ;;  %s2618_s12 = sphi %s2658_s12, %s3799_s12  }
   0x4   : > { %p24_p0 = scmp.ge.s32.totalorder %s23_s18, 4  ;;  %p42_p1 = scmp.ne.s32.totalorder %s2622_s13, %s2618_s12 }
   0x5   : > { %p43_p2 = scmp.eq.s32.totalorder %s2634_s16, 0  ;;  %s35_s20 = sadd.s32 1, %s2622_s13 }
   0x6   : > { %s3804_s18 = smov (%p24_p0, %s23_s18), 0  ;;  %p2368_p5 = scmp.ge.s32.totalorder %s2634_s16, 4 }
   0x7   : > { %p44_p3 = por %p43_p2, %p42_p1  ;;  %s31_s19 = ssub.s32 %s2630_s15, %s3804_s18 }
   0x8   : > { %p33_p4 = scmp.eq.s32.totalorder %s31_s19, 0  ;;  %144 = sbr.rel (%p2368_p5) target bundleno = 83 (0x53), region = 20 }
   0xa   : > { %s2694_s21 = scalar_select %p33_p4, %s2622_s13, %s35_s20  }
   0xf   : > { %147 = sbr.rel (!%p44_p3) target bundleno = 83 (0x53), region = 24  ;;  %s149_s22 = sand.u32 (%p44_p3), 1, %s2622_s13  }
  0x10   : > { %s2383_s23 = sshll.u32 (%p44_p3), %s2630_s15, 9  ;;  %s2369_s24 = sshll.u32 (%p44_p3), %s149_s22, 10 }
  0x11   : > { %s2702_s27 = scalar_lea.vmem (%p44_p3), %s3794_s0, %s2383_s23  ;;  %s2707_s28 = scalar_lea.vmem (%p44_p3), [#allocation3], %s2369_s24 }
  0x12   : > { %v439_v0 = vld [vmem:[%s2702_s27] sm:$0xff] (%p44_p3)  ;;  %v441_v1 = vld [vmem:[%s2702_s27 + $0x8] sm:$0xff] (%p44_p3)  ;;  %v443_v2 = vld [vmem:[%s2702_s27 + $0x10] sm:$0xff] (%p44_p3) }
  0x13   : > { %440 = vst [vmem:[%s2707_s28] sm:$0xff] (%p44_p3), %v439_v0  ;;  %442 = vst [vmem:[%s2707_s28 + $0x8] sm:$0xff] (%p44_p3), %v441_v1  ;;  %v445_v3 = vld [vmem:[%s2702_s27 + $0x18] sm:$0xff] (%p44_p3)  ;;  %v447_v4 = vld [vmem:[%s2702_s27 + $0x20] sm:$0xff] (%p44_p3) }
  0x14   : > { %444 = vst [vmem:[%s2707_s28 + $0x10] sm:$0xff] (%p44_p3), %v443_v2  ;;  %v449_v5 = vld [vmem:[%s2702_s27 + $0x28] sm:$0xff] (%p44_p3)  ;;  %446 = vst [vmem:[%s2707_s28 + $0x18] sm:$0xff] (%p44_p3), %v445_v3  ;;  %v451_v6 = vld [vmem:[%s2702_s27 + $0x30] sm:$0xff] (%p44_p3) }
  0x15   : > { %448 = vst [vmem:[%s2707_s28 + $0x20] sm:$0xff] (%p44_p3), %v447_v4  ;;  %450 = vst [vmem:[%s2707_s28 + $0x28] sm:$0xff] (%p44_p3), %v449_v5  ;;  %v453_v7 = vld [vmem:[%s2702_s27 + $0x38] sm:$0xff] (%p44_p3)  ;;  %v455_v8 = vld [vmem:[%s2702_s27 + $0x40] sm:$0xff] (%p44_p3) }
  0x16   : > { %452 = vst [vmem:[%s2707_s28 + $0x30] sm:$0xff] %v451_v6  ;;  %454 = vst [vmem:[%s2707_s28 + $0x38] sm:$0xff] %v453_v7  ;;  %v457_v9 = vld [vmem:[%s2702_s27 + $0x48] sm:$0xff]  ;;  %v459_v10 = vld [vmem:[%s2702_s27 + $0x50] sm:$0xff] }
  0x17   : > { %456 = vst [vmem:[%s2707_s28 + $0x40] sm:$0xff] %v455_v8  ;;  %v461_v11 = vld [vmem:[%s2702_s27 + $0x58] sm:$0xff]  ;;  %458 = vst [vmem:[%s2707_s28 + $0x48] sm:$0xff] %v457_v9  ;;  %v463_v12 = vld [vmem:[%s2702_s27 + $0x60] sm:$0xff] }
  0x18   : > { %460 = vst [vmem:[%s2707_s28 + $0x50] sm:$0xff] %v459_v10  ;;  %462 = vst [vmem:[%s2707_s28 + $0x58] sm:$0xff] %v461_v11  ;;  %v465_v13 = vld [vmem:[%s2702_s27 + $0x68] sm:$0xff]  ;;  %v467_v14 = vld [vmem:[%s2702_s27 + $0x70] sm:$0xff] }
  0x19   : > { %464 = vst [vmem:[%s2707_s28 + $0x60] sm:$0xff] %v463_v12  ;;  %466 = vst [vmem:[%s2707_s28 + $0x68] sm:$0xff] %v465_v13  ;;  %v469_v15 = vld [vmem:[%s2702_s27 + $0x78] sm:$0xff]  ;;  %v471_v16 = vld [vmem:[%s2702_s27 + $0x80] sm:$0xff] }
  0x1a   : > { %468 = vst [vmem:[%s2707_s28 + $0x70] sm:$0xff] %v467_v14  ;;  %v473_v17 = vld [vmem:[%s2702_s27 + $0x88] sm:$0xff]  ;;  %470 = vst [vmem:[%s2707_s28 + $0x78] sm:$0xff] %v469_v15  ;;  %v475_v18 = vld [vmem:[%s2702_s27 + $0x90] sm:$0xff] }
  0x1b   : > { %472 = vst [vmem:[%s2707_s28 + $0x80] sm:$0xff] %v471_v16  ;;  %474 = vst [vmem:[%s2707_s28 + $0x88] sm:$0xff] %v473_v17  ;;  %v477_v19 = vld [vmem:[%s2702_s27 + $0x98] sm:$0xff]  ;;  %v479_v20 = vld [vmem:[%s2702_s27 + $0xa0] sm:$0xff] }
  0x1c   : > { %476 = vst [vmem:[%s2707_s28 + $0x90] sm:$0xff] %v475_v18  ;;  %478 = vst [vmem:[%s2707_s28 + $0x98] sm:$0xff] %v477_v19  ;;  %v481_v21 = vld [vmem:[%s2702_s27 + $0xa8] sm:$0xff]  ;;  %v483_v22 = vld [vmem:[%s2702_s27 + $0xb0] sm:$0xff] }
  0x1d   : > { %480 = vst [vmem:[%s2707_s28 + $0xa0] sm:$0xff] %v479_v20  ;;  %v485_v23 = vld [vmem:[%s2702_s27 + $0xb8] sm:$0xff]  ;;  %482 = vst [vmem:[%s2707_s28 + $0xa8] sm:$0xff] %v481_v21  ;;  %v487_v24 = vld [vmem:[%s2702_s27 + $0xc0] sm:$0xff] }
  0x1e   : > { %484 = vst [vmem:[%s2707_s28 + $0xb0] sm:$0xff] %v483_v22  ;;  %486 = vst [vmem:[%s2707_s28 + $0xb8] sm:$0xff] %v485_v23  ;;  %v489_v25 = vld [vmem:[%s2702_s27 + $0xc8] sm:$0xff]  ;;  %v491_v26 = vld [vmem:[%s2702_s27 + $0xd0] sm:$0xff] }
  0x1f   : > { %488 = vst [vmem:[%s2707_s28 + $0xc0] sm:$0xff] %v487_v24  ;;  %490 = vst [vmem:[%s2707_s28 + $0xc8] sm:$0xff] %v489_v25  ;;  %v493_v27 = vld [vmem:[%s2702_s27 + $0xd8] sm:$0xff]  ;;  %v495_v28 = vld [vmem:[%s2702_s27 + $0xe0] sm:$0xff] }
  0x20   : > { %492 = vst [vmem:[%s2707_s28 + $0xd0] sm:$0xff] %v491_v26  ;;  %v497_v29 = vld [vmem:[%s2702_s27 + $0xe8] sm:$0xff]  ;;  %494 = vst [vmem:[%s2707_s28 + $0xd8] sm:$0xff] %v493_v27  ;;  %v499_v30 = vld [vmem:[%s2702_s27 + $0xf0] sm:$0xff] }
  0x21   : > { %496 = vst [vmem:[%s2707_s28 + $0xe0] sm:$0xff] %v495_v28  ;;  %498 = vst [vmem:[%s2707_s28 + $0xe8] sm:$0xff] %v497_v29  ;;  %v501_v31 = vld [vmem:[%s2702_s27 + $0xf8] sm:$0xff]  ;;  %v503_v32 = vld [vmem:[%s2702_s27 + $0x100] sm:$0xff] }
  0x22   : > { %500 = vst [vmem:[%s2707_s28 + $0xf0] sm:$0xff] %v499_v30  ;;  %502 = vst [vmem:[%s2707_s28 + $0xf8] sm:$0xff] %v501_v31  ;;  %v505_v33 = vld [vmem:[%s2702_s27 + $0x108] sm:$0xff]  ;;  %v507_v34 = vld [vmem:[%s2702_s27 + $0x110] sm:$0xff] }
  0x23   : > { %504 = vst [vmem:[%s2707_s28 + $0x100] sm:$0xff] %v503_v32  ;;  %v509_v35 = vld [vmem:[%s2702_s27 + $0x118] sm:$0xff]  ;;  %506 = vst [vmem:[%s2707_s28 + $0x108] sm:$0xff] %v505_v33  ;;  %v511_v36 = vld [vmem:[%s2702_s27 + $0x120] sm:$0xff] }
  0x24   : > { %508 = vst [vmem:[%s2707_s28 + $0x110] sm:$0xff] %v507_v34  ;;  %510 = vst [vmem:[%s2707_s28 + $0x118] sm:$0xff] %v509_v35  ;;  %v513_v37 = vld [vmem:[%s2702_s27 + $0x128] sm:$0xff]  ;;  %v515_v38 = vld [vmem:[%s2702_s27 + $0x130] sm:$0xff] }
  0x25   : > { %512 = vst [vmem:[%s2707_s28 + $0x120] sm:$0xff] %v511_v36  ;;  %514 = vst [vmem:[%s2707_s28 + $0x128] sm:$0xff] %v513_v37  ;;  %v517_v39 = vld [vmem:[%s2702_s27 + $0x138] sm:$0xff]  ;;  %v519_v40 = vld [vmem:[%s2702_s27 + $0x140] sm:$0xff] }
  0x26   : > { %516 = vst [vmem:[%s2707_s28 + $0x130] sm:$0xff] %v515_v38  ;;  %v521_v41 = vld [vmem:[%s2702_s27 + $0x148] sm:$0xff]  ;;  %518 = vst [vmem:[%s2707_s28 + $0x138] sm:$0xff] %v517_v39  ;;  %v523_v42 = vld [vmem:[%s2702_s27 + $0x150] sm:$0xff] }
  0x27   : > { %520 = vst [vmem:[%s2707_s28 + $0x140] sm:$0xff] %v519_v40  ;;  %522 = vst [vmem:[%s2707_s28 + $0x148] sm:$0xff] %v521_v41  ;;  %v525_v43 = vld [vmem:[%s2702_s27 + $0x158] sm:$0xff]  ;;  %v527_v44 = vld [vmem:[%s2702_s27 + $0x160] sm:$0xff] }
  0x28   : > { %524 = vst [vmem:[%s2707_s28 + $0x150] sm:$0xff] %v523_v42  ;;  %526 = vst [vmem:[%s2707_s28 + $0x158] sm:$0xff] %v525_v43  ;;  %v529_v45 = vld [vmem:[%s2702_s27 + $0x168] sm:$0xff]  ;;  %v531_v46 = vld [vmem:[%s2702_s27 + $0x170] sm:$0xff] }
  0x29   : > { %528 = vst [vmem:[%s2707_s28 + $0x160] sm:$0xff] %v527_v44  ;;  %v533_v47 = vld [vmem:[%s2702_s27 + $0x178] sm:$0xff]  ;;  %530 = vst [vmem:[%s2707_s28 + $0x168] sm:$0xff] %v529_v45  ;;  %v535_v48 = vld [vmem:[%s2702_s27 + $0x180] sm:$0xff] }
  0x2a   : > { %532 = vst [vmem:[%s2707_s28 + $0x170] sm:$0xff] %v531_v46  ;;  %534 = vst [vmem:[%s2707_s28 + $0x178] sm:$0xff] %v533_v47  ;;  %v537_v49 = vld [vmem:[%s2702_s27 + $0x188] sm:$0xff]  ;;  %v539_v50 = vld [vmem:[%s2702_s27 + $0x190] sm:$0xff] }
  0x2b   : > { %536 = vst [vmem:[%s2707_s28 + $0x180] sm:$0xff] %v535_v48  ;;  %538 = vst [vmem:[%s2707_s28 + $0x188] sm:$0xff] %v537_v49  ;;  %v541_v51 = vld [vmem:[%s2702_s27 + $0x198] sm:$0xff]  ;;  %v543_v52 = vld [vmem:[%s2702_s27 + $0x1a0] sm:$0xff] }
  0x2c   : > { %540 = vst [vmem:[%s2707_s28 + $0x190] sm:$0xff] %v539_v50  ;;  %v545_v53 = vld [vmem:[%s2702_s27 + $0x1a8] sm:$0xff]  ;;  %542 = vst [vmem:[%s2707_s28 + $0x198] sm:$0xff] %v541_v51  ;;  %v547_v54 = vld [vmem:[%s2702_s27 + $0x1b0] sm:$0xff] }
  0x2d   : > { %544 = vst [vmem:[%s2707_s28 + $0x1a0] sm:$0xff] %v543_v52  ;;  %546 = vst [vmem:[%s2707_s28 + $0x1a8] sm:$0xff] %v545_v53  ;;  %v549_v55 = vld [vmem:[%s2702_s27 + $0x1b8] sm:$0xff]  ;;  %v551_v56 = vld [vmem:[%s2702_s27 + $0x1c0] sm:$0xff] }
  0x2e   : > { %548 = vst [vmem:[%s2707_s28 + $0x1b0] sm:$0xff] %v547_v54  ;;  %550 = vst [vmem:[%s2707_s28 + $0x1b8] sm:$0xff] %v549_v55  ;;  %v553_v57 = vld [vmem:[%s2702_s27 + $0x1c8] sm:$0xff]  ;;  %v555_v58 = vld [vmem:[%s2702_s27 + $0x1d0] sm:$0xff] }
  0x2f   : > { %552 = vst [vmem:[%s2707_s28 + $0x1c0] sm:$0xff] %v551_v56  ;;  %v557_v59 = vld [vmem:[%s2702_s27 + $0x1d8] sm:$0xff]  ;;  %554 = vst [vmem:[%s2707_s28 + $0x1c8] sm:$0xff] %v553_v57  ;;  %v559_v60 = vld [vmem:[%s2702_s27 + $0x1e0] sm:$0xff] }
  0x30   : > { %556 = vst [vmem:[%s2707_s28 + $0x1d0] sm:$0xff] %v555_v58  ;;  %558 = vst [vmem:[%s2707_s28 + $0x1d8] sm:$0xff] %v557_v59  ;;  %v561_v61 = vld [vmem:[%s2702_s27 + $0x1e8] sm:$0xff]  ;;  %v563_v62 = vld [vmem:[%s2702_s27 + $0x1f0] sm:$0xff] }
  0x31   : > { %560 = vst [vmem:[%s2707_s28 + $0x1e0] sm:$0xff] %v559_v60  ;;  %562 = vst [vmem:[%s2707_s28 + $0x1e8] sm:$0xff] %v561_v61  ;;  %v565_v63 = vld [vmem:[%s2702_s27 + $0x1f8] sm:$0xff]  ;;  %v567_v0 = vld [vmem:[%s2702_s27 + $0x800] sm:$0xff] }
  0x32   : > { %564 = vst [vmem:[%s2707_s28 + $0x1f0] sm:$0xff] %v563_v62  ;;  %v569_v1 = vld [vmem:[%s2702_s27 + $0x808] sm:$0xff]  ;;  %566 = vst [vmem:[%s2707_s28 + $0x1f8] sm:$0xff] %v565_v63  ;;  %v571_v2 = vld [vmem:[%s2702_s27 + $0x810] sm:$0xff] }
  0x33   : > { %568 = vst [vmem:[%s2707_s28 + $0x200] sm:$0xff] %v567_v0  ;;  %570 = vst [vmem:[%s2707_s28 + $0x208] sm:$0xff] %v569_v1  ;;  %v573_v3 = vld [vmem:[%s2702_s27 + $0x818] sm:$0xff]  ;;  %v575_v4 = vld [vmem:[%s2702_s27 + $0x820] sm:$0xff] }
  0x34   : > { %572 = vst [vmem:[%s2707_s28 + $0x210] sm:$0xff] %v571_v2  ;;  %574 = vst [vmem:[%s2707_s28 + $0x218] sm:$0xff] %v573_v3  ;;  %v577_v5 = vld [vmem:[%s2702_s27 + $0x828] sm:$0xff]  ;;  %v579_v6 = vld [vmem:[%s2702_s27 + $0x830] sm:$0xff] }
  0x35   : > { %576 = vst [vmem:[%s2707_s28 + $0x220] sm:$0xff] %v575_v4  ;;  %v581_v7 = vld [vmem:[%s2702_s27 + $0x838] sm:$0xff]  ;;  %578 = vst [vmem:[%s2707_s28 + $0x228] sm:$0xff] %v577_v5  ;;  %v583_v8 = vld [vmem:[%s2702_s27 + $0x840] sm:$0xff] }
  0x36   : > { %580 = vst [vmem:[%s2707_s28 + $0x230] sm:$0xff] %v579_v6  ;;  %582 = vst [vmem:[%s2707_s28 + $0x238] sm:$0xff] %v581_v7  ;;  %v585_v9 = vld [vmem:[%s2702_s27 + $0x848] sm:$0xff]  ;;  %v587_v10 = vld [vmem:[%s2702_s27 + $0x850] sm:$0xff] }
  0x37   : > { %584 = vst [vmem:[%s2707_s28 + $0x240] sm:$0xff] %v583_v8  ;;  %586 = vst [vmem:[%s2707_s28 + $0x248] sm:$0xff] %v585_v9  ;;  %v589_v11 = vld [vmem:[%s2702_s27 + $0x858] sm:$0xff]  ;;  %v591_v12 = vld [vmem:[%s2702_s27 + $0x860] sm:$0xff] }
  0x38   : > { %588 = vst [vmem:[%s2707_s28 + $0x250] sm:$0xff] %v587_v10  ;;  %v593_v13 = vld [vmem:[%s2702_s27 + $0x868] sm:$0xff]  ;;  %590 = vst [vmem:[%s2707_s28 + $0x258] sm:$0xff] %v589_v11  ;;  %v595_v14 = vld [vmem:[%s2702_s27 + $0x870] sm:$0xff] }
  0x39   : > { %592 = vst [vmem:[%s2707_s28 + $0x260] sm:$0xff] %v591_v12  ;;  %594 = vst [vmem:[%s2707_s28 + $0x268] sm:$0xff] %v593_v13  ;;  %v597_v15 = vld [vmem:[%s2702_s27 + $0x878] sm:$0xff]  ;;  %v599_v16 = vld [vmem:[%s2702_s27 + $0x880] sm:$0xff] }
  0x3a   : > { %596 = vst [vmem:[%s2707_s28 + $0x270] sm:$0xff] %v595_v14  ;;  %598 = vst [vmem:[%s2707_s28 + $0x278] sm:$0xff] %v597_v15  ;;  %v601_v17 = vld [vmem:[%s2702_s27 + $0x888] sm:$0xff]  ;;  %v603_v18 = vld [vmem:[%s2702_s27 + $0x890] sm:$0xff] }
  0x3b   : > { %600 = vst [vmem:[%s2707_s28 + $0x280] sm:$0xff] %v599_v16  ;;  %v605_v19 = vld [vmem:[%s2702_s27 + $0x898] sm:$0xff]  ;;  %602 = vst [vmem:[%s2707_s28 + $0x288] sm:$0xff] %v601_v17  ;;  %v607_v20 = vld [vmem:[%s2702_s27 + $0x8a0] sm:$0xff] }
  0x3c   : > { %604 = vst [vmem:[%s2707_s28 + $0x290] sm:$0xff] %v603_v18  ;;  %606 = vst [vmem:[%s2707_s28 + $0x298] sm:$0xff] %v605_v19  ;;  %v609_v21 = vld [vmem:[%s2702_s27 + $0x8a8] sm:$0xff]  ;;  %v611_v22 = vld [vmem:[%s2702_s27 + $0x8b0] sm:$0xff] }
  0x3d   : > { %608 = vst [vmem:[%s2707_s28 + $0x2a0] sm:$0xff] %v607_v20  ;;  %610 = vst [vmem:[%s2707_s28 + $0x2a8] sm:$0xff] %v609_v21  ;;  %v613_v23 = vld [vmem:[%s2702_s27 + $0x8b8] sm:$0xff]  ;;  %v615_v24 = vld [vmem:[%s2702_s27 + $0x8c0] sm:$0xff] }
  0x3e   : > { %612 = vst [vmem:[%s2707_s28 + $0x2b0] sm:$0xff] %v611_v22  ;;  %v617_v25 = vld [vmem:[%s2702_s27 + $0x8c8] sm:$0xff]  ;;  %614 = vst [vmem:[%s2707_s28 + $0x2b8] sm:$0xff] %v613_v23  ;;  %v619_v26 = vld [vmem:[%s2702_s27 + $0x8d0] sm:$0xff] }
  0x3f   : > { %616 = vst [vmem:[%s2707_s28 + $0x2c0] sm:$0xff] %v615_v24  ;;  %618 = vst [vmem:[%s2707_s28 + $0x2c8] sm:$0xff] %v617_v25  ;;  %v621_v27 = vld [vmem:[%s2702_s27 + $0x8d8] sm:$0xff]  ;;  %v623_v28 = vld [vmem:[%s2702_s27 + $0x8e0] sm:$0xff] }
  0x40   : > { %620 = vst [vmem:[%s2707_s28 + $0x2d0] sm:$0xff] %v619_v26  ;;  %622 = vst [vmem:[%s2707_s28 + $0x2d8] sm:$0xff] %v621_v27  ;;  %v625_v29 = vld [vmem:[%s2702_s27 + $0x8e8] sm:$0xff]  ;;  %v627_v30 = vld [vmem:[%s2702_s27 + $0x8f0] sm:$0xff] }
  0x41   : > { %624 = vst [vmem:[%s2707_s28 + $0x2e0] sm:$0xff] %v623_v28  ;;  %v629_v31 = vld [vmem:[%s2702_s27 + $0x8f8] sm:$0xff]  ;;  %626 = vst [vmem:[%s2707_s28 + $0x2e8] sm:$0xff] %v625_v29  ;;  %v631_v32 = vld [vmem:[%s2702_s27 + $0x900] sm:$0xff] }
  0x42   : > { %628 = vst [vmem:[%s2707_s28 + $0x2f0] sm:$0xff] %v627_v30  ;;  %630 = vst [vmem:[%s2707_s28 + $0x2f8] sm:$0xff] %v629_v31  ;;  %v633_v33 = vld [vmem:[%s2702_s27 + $0x908] sm:$0xff]  ;;  %v635_v34 = vld [vmem:[%s2702_s27 + $0x910] sm:$0xff] }
  0x43   : > { %632 = vst [vmem:[%s2707_s28 + $0x300] sm:$0xff] %v631_v32  ;;  %634 = vst [vmem:[%s2707_s28 + $0x308] sm:$0xff] %v633_v33  ;;  %v637_v35 = vld [vmem:[%s2702_s27 + $0x918] sm:$0xff]  ;;  %v639_v36 = vld [vmem:[%s2702_s27 + $0x920] sm:$0xff] }
  0x44   : > { %636 = vst [vmem:[%s2707_s28 + $0x310] sm:$0xff] %v635_v34  ;;  %v641_v37 = vld [vmem:[%s2702_s27 + $0x928] sm:$0xff]  ;;  %638 = vst [vmem:[%s2707_s28 + $0x318] sm:$0xff] %v637_v35  ;;  %v643_v38 = vld [vmem:[%s2702_s27 + $0x930] sm:$0xff] }
  0x45   : > { %640 = vst [vmem:[%s2707_s28 + $0x320] sm:$0xff] %v639_v36  ;;  %642 = vst [vmem:[%s2707_s28 + $0x328] sm:$0xff] %v641_v37  ;;  %v645_v39 = vld [vmem:[%s2702_s27 + $0x938] sm:$0xff]  ;;  %v647_v40 = vld [vmem:[%s2702_s27 + $0x940] sm:$0xff] }
  0x46   : > { %644 = vst [vmem:[%s2707_s28 + $0x330] sm:$0xff] %v643_v38  ;;  %646 = vst [vmem:[%s2707_s28 + $0x338] sm:$0xff] %v645_v39  ;;  %v649_v41 = vld [vmem:[%s2702_s27 + $0x948] sm:$0xff]  ;;  %v651_v42 = vld [vmem:[%s2702_s27 + $0x950] sm:$0xff] }
  0x47   : > { %648 = vst [vmem:[%s2707_s28 + $0x340] sm:$0xff] %v647_v40  ;;  %v653_v43 = vld [vmem:[%s2702_s27 + $0x958] sm:$0xff]  ;;  %650 = vst [vmem:[%s2707_s28 + $0x348] sm:$0xff] %v649_v41  ;;  %v655_v44 = vld [vmem:[%s2702_s27 + $0x960] sm:$0xff] }
  0x48   : > { %652 = vst [vmem:[%s2707_s28 + $0x350] sm:$0xff] %v651_v42  ;;  %654 = vst [vmem:[%s2707_s28 + $0x358] sm:$0xff] %v653_v43  ;;  %v657_v45 = vld [vmem:[%s2702_s27 + $0x968] sm:$0xff]  ;;  %v659_v46 = vld [vmem:[%s2702_s27 + $0x970] sm:$0xff] }
  0x49   : > { %656 = vst [vmem:[%s2707_s28 + $0x360] sm:$0xff] %v655_v44  ;;  %658 = vst [vmem:[%s2707_s28 + $0x368] sm:$0xff] %v657_v45  ;;  %v661_v47 = vld [vmem:[%s2702_s27 + $0x978] sm:$0xff]  ;;  %v663_v48 = vld [vmem:[%s2702_s27 + $0x980] sm:$0xff] }
  0x4a   : > { %660 = vst [vmem:[%s2707_s28 + $0x370] sm:$0xff] %v659_v46  ;;  %v665_v49 = vld [vmem:[%s2702_s27 + $0x988] sm:$0xff]  ;;  %662 = vst [vmem:[%s2707_s28 + $0x378] sm:$0xff] %v661_v47  ;;  %v667_v50 = vld [vmem:[%s2702_s27 + $0x990] sm:$0xff] }
  0x4b   : > { %664 = vst [vmem:[%s2707_s28 + $0x380] sm:$0xff] %v663_v48  ;;  %666 = vst [vmem:[%s2707_s28 + $0x388] sm:$0xff] %v665_v49  ;;  %v669_v51 = vld [vmem:[%s2702_s27 + $0x998] sm:$0xff]  ;;  %v671_v52 = vld [vmem:[%s2702_s27 + $0x9a0] sm:$0xff] }
  0x4c   : > { %668 = vst [vmem:[%s2707_s28 + $0x390] sm:$0xff] %v667_v50  ;;  %670 = vst [vmem:[%s2707_s28 + $0x398] sm:$0xff] %v669_v51  ;;  %v673_v53 = vld [vmem:[%s2702_s27 + $0x9a8] sm:$0xff]  ;;  %v675_v54 = vld [vmem:[%s2702_s27 + $0x9b0] sm:$0xff] }
  0x4d   : > { %672 = vst [vmem:[%s2707_s28 + $0x3a0] sm:$0xff] %v671_v52  ;;  %v677_v55 = vld [vmem:[%s2702_s27 + $0x9b8] sm:$0xff]  ;;  %674 = vst [vmem:[%s2707_s28 + $0x3a8] sm:$0xff] %v673_v53  ;;  %v679_v56 = vld [vmem:[%s2702_s27 + $0x9c0] sm:$0xff] }
  0x4e   : > { %676 = vst [vmem:[%s2707_s28 + $0x3b0] sm:$0xff] %v675_v54  ;;  %678 = vst [vmem:[%s2707_s28 + $0x3b8] sm:$0xff] %v677_v55  ;;  %v681_v57 = vld [vmem:[%s2702_s27 + $0x9c8] sm:$0xff]  ;;  %v683_v58 = vld [vmem:[%s2702_s27 + $0x9d0] sm:$0xff] }
  0x4f   : > { %680 = vst [vmem:[%s2707_s28 + $0x3c0] sm:$0xff] %v679_v56  ;;  %682 = vst [vmem:[%s2707_s28 + $0x3c8] sm:$0xff] %v681_v57  ;;  %v685_v59 = vld [vmem:[%s2702_s27 + $0x9d8] sm:$0xff]  ;;  %v687_v60 = vld [vmem:[%s2702_s27 + $0x9e0] sm:$0xff] }
  0x50   : > { %684 = vst [vmem:[%s2707_s28 + $0x3d0] sm:$0xff] %v683_v58  ;;  %v689_v61 = vld [vmem:[%s2702_s27 + $0x9e8] sm:$0xff]  ;;  %686 = vst [vmem:[%s2707_s28 + $0x3d8] sm:$0xff] %v685_v59  ;;  %v691_v62 = vld [vmem:[%s2702_s27 + $0x9f0] sm:$0xff] }
  0x51   : > { %688 = vst [vmem:[%s2707_s28 + $0x3e0] sm:$0xff] %v687_v60  ;;  %690 = vst [vmem:[%s2707_s28 + $0x3e8] sm:$0xff] %v689_v61  ;;  %v693_v63 = vld [vmem:[%s2702_s27 + $0x9f8] sm:$0xff] }
  0x52   : > { %692 = vst [vmem:[%s2707_s28 + $0x3f0] sm:$0xff] %v691_v62  ;;  %694 = vst [vmem:[%s2707_s28 + $0x3f8] sm:$0xff] %v693_v63 }
  0x53 PF: > { %p2372_p6 = scmp.ge.s32.totalorder %s2634_s16, 1  ;;  %p708_p7 = scmp.lt.s32.totalorder %s2634_s16, 5 }
  0x55   : > { %p709_p8 = pnand %p2372_p6, %p708_p7 }
  0x56   : > { %s715_s29 = sand.u32 (!%p709_p8), 1, %s2618_s12   ;;  %s2374_s30 = sshll.u32 (!%p709_p8), %s2626_s14, 6 }
  0x57   : > { %712 = sbr.rel (%p709_p8) target bundleno = 757 (0x2f5), region = 66  ;;  %s2373_s4 = sshll.u32 (!%p709_p8), %s715_s29, 10 }
  0x58   : > { %p741_p9 = scmp.lt.s32.totalorder (!%p709_p8), %s2374_s30, 255  ;;  %s2971_s9 = scalar_lea.vmem (!%p709_p8), [#allocation3], %s2373_s4 }
  0x59   : > { %p2376_p10 = scmp.ne.s32.totalorder (!%p709_p8), %s2626_s14, 0 }
  0x5e   : > { %s3806_s30 = smov (!%p741_p9, %s2374_s30), 255  ;;  %749 = sbr.rel (%p2376_p10) target bundleno = 101 (0x65), region = 74 }
  0x5f   : > { %s2375_s5 = sshll.u32 %s3806_s30, 3  ;;  %v2636_v0 = vmov (!%p2376_p10), 0.0  }
  0x60   : > { %s2969_s8 = scalar_lea.vmem %s3795_s1, %s2375_s5  ;;  %750 = vst [vmem:[#allocation2] sm:$0x3] (!%p2376_p10), %v2636_v0 }
  0x65 PF: > { %v799_v1 = vld [vmem:[%s2971_s9 + $0x180] sm:$0xff]  ;;  %vm879_vm0 = vcmask 400384   ;;  %v800_v3 = vld [vmem:[%s2971_s9 + $0x188] sm:$0xff]  ;;  %v769_v22 = vld [vmem:[%s2971_s9 + $0x90] sm:$0xff]  ;;  %vm1468_vm1 = vcmask 130112   ;;  %vm1475_vm2 = vcmask 195712  }
  0x66   : > { %v767_v2 = vld [vmem:[%s2971_s9 + $0x80] sm:$0xff]  ;;  %v1024_v4 = vsel %vm879_vm0, %v799_v1, 0.0  ;;  %v768_v6 = vld [vmem:[%s2971_s9 + $0x88] sm:$0xff]  ;;  %v1027_v7 = vsel %vm879_vm0, %v800_v3, 0.0  ;;  %v934_v24 = vsel %vm879_vm0, %v769_v22, 0.0  ;;  %v801_v25 = vld [vmem:[%s2971_s9 + $0x190] sm:$0xff] }
  0x67   : > { %v928_v5 = vsel %vm879_vm0, %v767_v2, 0.0  ;;  %1025 = vadd.xlane.f32.xlu1 %v1024_v4  ;;  %v931_v8 = vsel %vm879_vm0, %v768_v6, 0.0  ;;  %v832_v9 = vld [vmem:[%s2971_s9 + $0x288] sm:$0xff]  ;;  %v831_v10 = vld [vmem:[%s2971_s9 + $0x280] sm:$0xff]  ;;  %v1030_v27 = vsel %vm879_vm0, %v801_v25, 0.0  ;;  %v833_v34 = vld [vmem:[%s2971_s9 + $0x290] sm:$0xff] }
  0x68   : > { %929 = vadd.xlane.f32.xlu0 %v928_v5  ;;  %v1123_v11 = vsel %vm879_vm0, %v832_v9, 0.0  ;;  %v1120_v12 = vsel %vm879_vm0, %v831_v10, 0.0  ;;  %v864_v13 = vld [vmem:[%s2971_s9 + $0x388] sm:$0xff]  ;;  %v863_v14 = vld [vmem:[%s2971_s9 + $0x380] sm:$0xff]  ;;  %v1126_v36 = vsel %vm879_vm0, %v833_v34, 0.0  ;;  %v865_v37 = vld [vmem:[%s2971_s9 + $0x390] sm:$0xff] }
  0x69   : > { %v1219_v15 = vsel %vm879_vm0, %v864_v13, 0.0  ;;  %v1216_v16 = vsel %vm879_vm0, %v863_v14, 0.0  ;;  %v752_v17 = vld [vmem:[%s2971_s9 + $0x8] sm:$0xff]  ;;  %v751_v18 = vld [vmem:[%s2971_s9] sm:$0xff]  ;;  %v1222_v39 = vsel %vm879_vm0, %v865_v37, 0.0  ;;  %v770_v41 = vld [vmem:[%s2971_s9 + $0x98] sm:$0xff] }
  0x6a   : > { %v883_v19 = vsel %vm879_vm0, %v752_v17, 0.0  ;;  %v880_v20 = vsel %vm879_vm0, %v751_v18, 0.0  ;;  %v783_v21 = vld [vmem:[%s2971_s9 + $0x100] sm:$0xff]  ;;  %v784_v26 = vld [vmem:[%s2971_s9 + $0x108] sm:$0xff]  ;;  %v753_v42 = vld [vmem:[%s2971_s9 + $0x10] sm:$0xff]  ;;  %v937_v43 = vsel %vm879_vm0, %v770_v41, 0.0 }
  0x6b   : > { %1028 = vadd.xlane.f32.xlu1 %v1027_v7  ;;  %v976_v23 = vsel %vm879_vm0, %v783_v21, 0.0  ;;  %v979_v28 = vsel %vm879_vm0, %v784_v26, 0.0  ;;  %v816_v29 = vld [vmem:[%s2971_s9 + $0x208] sm:$0xff]  ;;  %v815_v30 = vld [vmem:[%s2971_s9 + $0x200] sm:$0xff]  ;;  %v886_v44 = vsel %vm879_vm0, %v753_v42, 0.0  ;;  %v802_v45 = vld [vmem:[%s2971_s9 + $0x198] sm:$0xff] }
  0x6c   : > { %932 = vadd.xlane.f32.xlu0 %v931_v8  ;;  %v1075_v31 = vsel %vm879_vm0, %v816_v29, 0.0  ;;  %v1072_v32 = vsel %vm879_vm0, %v815_v30, 0.0  ;;  %v847_v33 = vld [vmem:[%s2971_s9 + $0x300] sm:$0xff]  ;;  %v848_v38 = vld [vmem:[%s2971_s9 + $0x308] sm:$0xff]  ;;  %v785_v46 = vld [vmem:[%s2971_s9 + $0x110] sm:$0xff]  ;;  %v1033_v47 = vsel %vm879_vm0, %v802_v45, 0.0 }
  0x6d   : > { %v1168_v35 = vsel %vm879_vm0, %v847_v33, 0.0  ;;  %v1171_v40 = vsel %vm879_vm0, %v848_v38, 0.0  ;;  %v982_v48 = vsel %vm879_vm0, %v785_v46, 0.0  ;;  %v834_v49 = vld [vmem:[%s2971_s9 + $0x298] sm:$0xff]  ;;  %v817_v50 = vld [vmem:[%s2971_s9 + $0x210] sm:$0xff]  ;;  %v771_v57 = vld [vmem:[%s2971_s9 + $0xa0] sm:$0xff] }
  0x6e   : > { %v1129_v51 = vsel %vm879_vm0, %v834_v49, 0.0  ;;  %v1078_v52 = vsel %vm879_vm0, %v817_v50, 0.0  ;;  %v866_v53 = vld [vmem:[%s2971_s9 + $0x398] sm:$0xff]  ;;  %v849_v54 = vld [vmem:[%s2971_s9 + $0x310] sm:$0xff]  ;;  %v940_v59 = vsel %vm879_vm0, %v771_v57, 0.0  ;;  %v803_v61 = vld [vmem:[%s2971_s9 + $0x1a0] sm:$0xff] }
  0x6f   : > { %1124 = vadd.xlane.f32.xlu1 %v1123_v11  ;;  %v1225_v55 = vsel %vm879_vm0, %v866_v53, 0.0  ;;  %v1174_v56 = vsel %vm879_vm0, %v849_v54, 0.0  ;;  %v754_v58 = vld [vmem:[%s2971_s9 + $0x18] sm:$0xff]  ;;  %v1036_v63 = vsel %vm879_vm0, %v803_v61, 0.0  ;;  %v835_v1 = vld [vmem:[%s2971_s9 + $0x2a0] sm:$0xff]  ;;  %v772_v9 = vld [vmem:[%s2971_s9 + $0xa8] sm:$0xff] }
  0x70   : > { %1121 = vadd.xlane.f32.xlu0 %v1120_v12  ;;  %v889_v60 = vsel %vm879_vm0, %v754_v58, 0.0  ;;  %v786_v62 = vld [vmem:[%s2971_s9 + $0x118] sm:$0xff]  ;;  %v1132_v3 = vsel %vm879_vm0, %v835_v1, 0.0  ;;  %v867_v5 = vld [vmem:[%s2971_s9 + $0x3a0] sm:$0xff]  ;;  %v943_v11 = vsel %vm879_vm0, %v772_v9, 0.0  ;;  %v804_v13 = vld [vmem:[%s2971_s9 + $0x1a8] sm:$0xff] }
  0x71   : > { %v985_v0 = vsel %vm879_vm0, %v786_v62, 0.0  ;;  %v818_v2 = vld [vmem:[%s2971_s9 + $0x218] sm:$0xff]  ;;  %v1228_v7 = vsel %vm879_vm0, %v867_v5, 0.0  ;;  %v755_v10 = vld [vmem:[%s2971_s9 + $0x20] sm:$0xff]  ;;  %v836_v17 = vld [vmem:[%s2971_s9 + $0x2a8] sm:$0xff]  ;;  %vm1482_vm3 = vcmask 261312  }
  0x72   : > { %v1081_v4 = vsel %vm879_vm0, %v818_v2, 0.0  ;;  %v850_v6 = vld [vmem:[%s2971_s9 + $0x318] sm:$0xff]  ;;  %v892_v12 = vsel %vm879_vm0, %v755_v10, 0.0  ;;  %v787_v14 = vld [vmem:[%s2971_s9 + $0x120] sm:$0xff]  ;;  %v868_v21 = vld [vmem:[%s2971_s9 + $0x3a8] sm:$0xff]  ;;  %vm1489_vm4 = vcmask 326912  }
  0x73   : > { %1220 = vadd.xlane.f32.xlu1 %v1219_v15  ;;  %v1177_v8 = vsel %vm879_vm0, %v850_v6, 0.0  ;;  %v1039_v15 = vsel %vm879_vm0, %v804_v13, 0.0  ;;  %v819_v18 = vld [vmem:[%s2971_s9 + $0x220] sm:$0xff]  ;;  %v773_v25 = vld [vmem:[%s2971_s9 + $0xb0] sm:$0xff]  ;;  %v756_v26 = vld [vmem:[%s2971_s9 + $0x28] sm:$0xff]  ;;  %vm1496_vm5 = vcmask 392512  }
  0x74   : > { %1217 = vadd.xlane.f32.xlu0 %v1216_v16  ;;  %v988_v16 = vsel %vm879_vm0, %v787_v14, 0.0  ;;  %v851_v22 = vld [vmem:[%s2971_s9 + $0x320] sm:$0xff]  ;;  %v805_v29 = vld [vmem:[%s2971_s9 + $0x1b0] sm:$0xff]  ;;  %v788_v30 = vld [vmem:[%s2971_s9 + $0x128] sm:$0xff]  ;;  %vm1503_vm6 = vcmask 458112   ;;  %vm1510_vm7 = vcmask 523712  }
  0x75   : > { %v837_v33 = vld [vmem:[%s2971_s9 + $0x2b0] sm:$0xff]  ;;  %v820_v34 = vld [vmem:[%s2971_s9 + $0x228] sm:$0xff]  ;;  %v774_v41 = vld [vmem:[%s2971_s9 + $0xb8] sm:$0xff]  ;;  %vm1517_vm8 = vcmask 589312   ;;  %vm1524_vm9 = vcmask 654912   ;;  %vm1531_vm10 = vcmask 720512  }
  0x76   : > { %v869_v37 = vld [vmem:[%s2971_s9 + $0x3b0] sm:$0xff]  ;;  %v852_v38 = vld [vmem:[%s2971_s9 + $0x328] sm:$0xff]  ;;  %v806_v45 = vld [vmem:[%s2971_s9 + $0x1b8] sm:$0xff]  ;;  %vm1538_vm11 = vcmask 786112   ;;  %vm1545_vm12 = vcmask 851712   ;;  %vm1552_vm13 = vcmask 917312  }
  0x77   : > { %884 = vadd.xlane.f32.xlu1 %v883_v19  ;;  %v1135_v19 = vsel %vm879_vm0, %v836_v17, 0.0  ;;  %v757_v42 = vld [vmem:[%s2971_s9 + $0x30] sm:$0xff]  ;;  %v838_v49 = vld [vmem:[%s2971_s9 + $0x2b8] sm:$0xff]  ;;  %v775_v57 = vld [vmem:[%s2971_s9 + $0xc0] sm:$0xff]  ;;  %vm1559_vm14 = vcmask 982912   ;;  %vm1566_vm15 = vcmask 1048512  }
  0x78   : > { %881 = vadd.xlane.f32.xlu0 %v880_v20  ;;  %v1084_v20 = vsel %vm879_vm0, %v819_v18, 0.0  ;;  %v789_v46 = vld [vmem:[%s2971_s9 + $0x130] sm:$0xff]  ;;  %v870_v53 = vld [vmem:[%s2971_s9 + $0x3b8] sm:$0xff]  ;;  %v807_v61 = vld [vmem:[%s2971_s9 + $0x1c0] sm:$0xff]  ;;  %p2377_p11 = scmp.ne.s32.totalorder %s2626_s14, 3 }
  0x79   : > { %v821_v50 = vld [vmem:[%s2971_s9 + $0x230] sm:$0xff]  ;;  %v758_v58 = vld [vmem:[%s2971_s9 + $0x38] sm:$0xff]  ;;  %v839_v1 = vld [vmem:[%s2971_s9 + $0x2c0] sm:$0xff] }
  0x7a   : > { %v853_v54 = vld [vmem:[%s2971_s9 + $0x330] sm:$0xff]  ;;  %v790_v62 = vld [vmem:[%s2971_s9 + $0x138] sm:$0xff]  ;;  %v871_v5 = vld [vmem:[%s2971_s9 + $0x3c0] sm:$0xff] }
  0x7b   : > { %977 = vadd.xlane.f32.xlu1 %v976_v23  ;;  %v1231_v23 = vsel %vm879_vm0, %v868_v21, 0.0  ;;  %v822_v2 = vld [vmem:[%s2971_s9 + $0x238] sm:$0xff]  ;;  %v776_v9 = vld [vmem:[%s2971_s9 + $0xc8] sm:$0xff]  ;;  %v759_v10 = vld [vmem:[%s2971_s9 + $0x40] sm:$0xff] }
  0x7c   : > { %935 = vadd.xlane.f32.xlu0 %v934_v24  ;;  %v1180_v24 = vsel %vm879_vm0, %v851_v22, 0.0  ;;  %v854_v6 = vld [vmem:[%s2971_s9 + $0x338] sm:$0xff]  ;;  %v904_v13 = vsel %vm879_vm0, %v759_v10, 0.0  ;;  %v808_v14 = vld [vmem:[%s2971_s9 + $0x1c8] sm:$0xff]  ;;  %v823_v21 = vld [vmem:[%s2971_s9 + $0x240] sm:$0xff] }
  0x7d   : > { %v1051_v17 = vsel %vm879_vm0, %v808_v14, 0.0  ;;  %v761_v14 = vld [vmem:[%s2971_s9 + $0x50] sm:$0xff] }
  0x7f   : > { %1031 = vadd.xlane.f32.xlu1 %v1030_v27  ;;  %v946_v27 = vsel %vm879_vm0, %v773_v25, 0.0 }
  0x80   : > { %980 = vadd.xlane.f32.xlu0 %v979_v28  ;;  %v895_v28 = vsel %vm879_vm0, %v756_v26, 0.0  ;;  %v1096_v26 = vsel %vm879_vm0, %v823_v21, 0.0  ;;  %v910_v21 = vsel %vm879_vm0, %v761_v14, 0.0  ;;  %v826_v14 = vld [vmem:[%s2971_s9 + $0x258] sm:$0xff] }
  0x83   : > { %1076 = vadd.xlane.f32.xlu1 %v1075_v31  ;;  %v1042_v31 = vsel %vm879_vm0, %v805_v29, 0.0  ;;  %v872_v29 = vld [vmem:[%s2971_s9 + $0x3c8] sm:$0xff] }
  0x84   : > { %1073 = vadd.xlane.f32.xlu0 %v1072_v32  ;;  %v991_v32 = vsel %vm879_vm0, %v788_v30, 0.0  ;;  %v855_v30 = vld [vmem:[%s2971_s9 + $0x340] sm:$0xff] }
  0x87   : > { %1169 = vadd.xlane.f32.xlu1 %v1168_v35  ;;  %v1138_v35 = vsel %vm879_vm0, %v837_v33, 0.0  ;;  %v1243_v33 = vsel %vm879_vm0, %v872_v29, 0.0 }
  0x88   : > { %1127 = vadd.xlane.f32.xlu0 %v1126_v36  ;;  %v1087_v36 = vsel %vm879_vm0, %v820_v34, 0.0  ;;  %v1192_v34 = vsel %vm879_vm0, %v855_v30, 0.0 }
  0x8b   : > { %1223 = vadd.xlane.f32.xlu1 %v1222_v39  ;;  %v1234_v39 = vsel %vm879_vm0, %v869_v37, 0.0 }
  0x8c   : > { %1172 = vadd.xlane.f32.xlu0 %v1171_v40  ;;  %v1183_v40 = vsel %vm879_vm0, %v852_v38, 0.0 }
  0x8f   : > { %938 = vadd.xlane.f32.xlu1 %v937_v43  ;;  %v949_v43 = vsel %vm879_vm0, %v774_v41, 0.0 }
  0x90   : > { %887 = vadd.xlane.f32.xlu0 %v886_v44  ;;  %v898_v44 = vsel %vm879_vm0, %v757_v42, 0.0 }
  0x93   : > { %1034 = vadd.xlane.f32.xlu1 %v1033_v47  ;;  %v1045_v47 = vsel %vm879_vm0, %v806_v45, 0.0 }
  0x94   : > { %983 = vadd.xlane.f32.xlu0 %v982_v48  ;;  %v994_v48 = vsel %vm879_vm0, %v789_v46, 0.0 }
  0x97   : > { %1130 = vadd.xlane.f32.xlu1 %v1129_v51  ;;  %v1141_v51 = vsel %vm879_vm0, %v838_v49, 0.0  ;;  %v809_v49 = vld [vmem:[%s2971_s9 + $0x1d0] sm:$0xff] }
  0x98   : > { %1079 = vadd.xlane.f32.xlu0 %v1078_v52  ;;  %v1090_v52 = vsel %vm879_vm0, %v821_v50, 0.0  ;;  %v792_v50 = vld [vmem:[%s2971_s9 + $0x148] sm:$0xff] }
  0x9b   : > { %1226 = vadd.xlane.f32.xlu1 %v1225_v55  ;;  %v1237_v55 = vsel %vm879_vm0, %v870_v53, 0.0 }
  0x9c   : > { %1175 = vadd.xlane.f32.xlu0 %v1174_v56  ;;  %v1186_v56 = vsel %vm879_vm0, %v853_v54, 0.0  ;;  %v1054_v54 = vsel %vm879_vm0, %v809_v49, 0.0 }
  0x9f   : > { %941 = vadd.xlane.f32.xlu1 %v940_v59  ;;  %v952_v59 = vsel %vm879_vm0, %v775_v57, 0.0 }
  0xa0   : > { %890 = vadd.xlane.f32.xlu0 %v889_v60  ;;  %v901_v60 = vsel %vm879_vm0, %v758_v58, 0.0  ;;  %v841_v58 = vld [vmem:[%s2971_s9 + $0x2d0] sm:$0xff] }
  0xa3   : > { %1037 = vadd.xlane.f32.xlu1 %v1036_v63  ;;  %v1048_v63 = vsel %vm879_vm0, %v807_v61, 0.0 }
  0xa4   : > { %986 = vadd.xlane.f32.xlu0 %v985_v0  ;;  %v997_v0 = vsel %vm879_vm0, %v790_v62, 0.0 }
  0xa7   : > { %1133 = vadd.xlane.f32.xlu1 %v1132_v3  ;;  %v1144_v3 = vsel %vm879_vm0, %v839_v1, 0.0 }
  0xa8   : > { %1082 = vadd.xlane.f32.xlu0 %v1081_v4  ;;  %v1093_v4 = vsel %vm879_vm0, %v822_v2, 0.0 }
  0xab   : > { %1229 = vadd.xlane.f32.xlu1 %v1228_v7  ;;  %v1240_v7 = vsel %vm879_vm0, %v871_v5, 0.0  ;;  %v873_v5 = vld [vmem:[%s2971_s9 + $0x3d0] sm:$0xff] }
  0xac   : > { %1178 = vadd.xlane.f32.xlu0 %v1177_v8  ;;  %v1189_v8 = vsel %vm879_vm0, %v854_v6, 0.0  ;;  %v856_v6 = vld [vmem:[%s2971_s9 + $0x348] sm:$0xff]  ;;  %v1246_v10 = vsel %vm879_vm0, %v873_v5, 0.0 }
  0xaf   : > { %944 = vadd.xlane.f32.xlu1 %v943_v11  ;;  %v1457_v11 = vlaneseq }
  0xb0   : > { %893 = vadd.xlane.f32.xlu0 %v892_v12  ;;  %v955_v12 = vsel %vm879_vm0, %v776_v9, 0.0 }
  0xb3   : > { %1040 = vadd.xlane.f32.xlu1 %v1039_v15  ;;  %v791_v15 = vld [vmem:[%s2971_s9 + $0x140] sm:$0xff] }
  0xb4   : > { %989 = vadd.xlane.f32.xlu0 %v988_v16  ;;  %v3116_v16 = vand.u32 127, %v1457_v11  ;;  %v1000_v18 = vsel %vm879_vm0, %v791_v15, 0.0 }
  0xb6   : > { %v1463_v22 = vadd.s32 4294967288, %v3116_v16 }
  0xb7   : > { %1136 = vadd.xlane.f32.xlu1 %v1135_v19  ;;  %v3120_v19 = vshrl.u32 %v1457_v11, 7  ;;  %v1195_v11 = vsel %vm879_vm0, %v856_v6, 0.0 }
  0xb8   : > { %1085 = vadd.xlane.f32.xlu0 %v1084_v20  ;;  %v840_v20 = vld [vmem:[%s2971_s9 + $0x2c8] sm:$0xff] }
  0xb9   : > { %v1147_v25 = vsel %vm879_vm0, %v840_v20, 0.0 }
  0xbb   : > { %1232 = vadd.xlane.f32.xlu1 %v1231_v23 }
  0xbc   : > { %1181 = vadd.xlane.f32.xlu0 %v1180_v24 }
  0xbf   : > { %947 = vadd.xlane.f32.xlu1 %v946_v27  ;;  %v3129_v27 = vsub.s32 %v3116_v16, %v3120_v19 }
  0xc0   : > { %896 = vadd.xlane.f32.xlu0 %v895_v28  ;;  %v3132_v28 = vsub.s32 %v1463_v22, %v3120_v19 }
  0xc3   : > { %1043 = vadd.xlane.f32.xlu1 %v1042_v31 }
  0xc4   : > { %992 = vadd.xlane.f32.xlu0 %v991_v32 }
  0xc7   : > { %1139 = vadd.xlane.f32.xlu1 %v1138_v35 }
  0xc8   : > { %1088 = vadd.xlane.f32.xlu0 %v1087_v36 }
  0xcb   : > { %1235 = vadd.xlane.f32.xlu1 %v1234_v39  ;;  %v777_v39 = vld [vmem:[%s2971_s9 + $0xd0] sm:$0xff] }
  0xcc   : > { %1184 = vadd.xlane.f32.xlu0 %v1183_v40  ;;  %v760_v40 = vld [vmem:[%s2971_s9 + $0x48] sm:$0xff]  ;;  %v958_v45 = vsel %vm879_vm0, %v777_v39, 0.0 }
  0xcd   : > { %v907_v46 = vsel %vm879_vm0, %v760_v40, 0.0 }
  0xcf   : > { %950 = vadd.xlane.f32.xlu1 %v949_v43 }
  0xd0   : > { %899 = vadd.xlane.f32.xlu0 %v898_v44 }
  0xd3   : > { %1046 = vadd.xlane.f32.xlu1 %v1045_v47 }
  0xd4   : > { %995 = vadd.xlane.f32.xlu0 %v994_v48 }
  0xd7   : > { %1142 = vadd.xlane.f32.xlu1 %v1141_v51 }
  0xd8   : > { %1091 = vadd.xlane.f32.xlu0 %v1090_v52 }
  0xdb   : > { %1238 = vadd.xlane.f32.xlu1 %v1237_v55  ;;  %v1003_v55 = vsel %vm879_vm0, %v792_v50, 0.0 }
  0xdc   : > { %1187 = vadd.xlane.f32.xlu0 %v1186_v56 }
  0xdf   : > { %953 = vadd.xlane.f32.xlu1 %v952_v59  ;;  %v824_v59 = vld [vmem:[%s2971_s9 + $0x248] sm:$0xff] }
  0xe0   : > { %902 = vadd.xlane.f32.xlu0 %v901_v60  ;;  %v1470_v60 = vadd.s32 4294967280, %v3116_v16  ;;  %v1099_v1 = vsel %vm879_vm0, %v824_v59, 0.0 }
  0xe3   : > { %1049 = vadd.xlane.f32.xlu1 %v1048_v63 }
  0xe4   : > { %998 = vadd.xlane.f32.xlu0 %v997_v0  ;;  %v1150_v0 = vsel %vm879_vm0, %v841_v58, 0.0  ;;  %v762_v58 = vld [vmem:[%s2971_s9 + $0x58] sm:$0xff] }
  0xe7   : > { %1145 = vadd.xlane.f32.xlu1 %v1144_v3 }
  0xe8   : > { %1094 = vadd.xlane.f32.xlu0 %v1093_v4  ;;  %v3170_v4 = vsub.s32 %v1470_v60, %v3120_v19 }
  0xeb   : > { %1241 = vadd.xlane.f32.xlu1 %v1240_v7 }
  0xec   : > { %1190 = vadd.xlane.f32.xlu0 %v1189_v8 }
  0xef   : > { %956 = vadd.xlane.f32.xlu1 %v955_v12 }
  0xf0   : > { %905 = vadd.xlane.f32.xlu0 %v904_v13  ;;  %v778_v13 = vld [vmem:[%s2971_s9 + $0xd8] sm:$0xff] }
  0xf1   : > { %v961_v20 = vsel %vm879_vm0, %v778_v13, 0.0  ;;  %v843_v13 = vld [vmem:[%s2971_s9 + $0x2e0] sm:$0xff] }
  0xf3   : > { %1052 = vadd.xlane.f32.xlu1 %v1051_v17 }
  0xf4   : > { %1001 = vadd.xlane.f32.xlu0 %v1000_v18  ;;  %v1026_v23 = vpop.xlane.xlu1 %1025 }
  0xf5   : > { %v930_v24 = vpop.xlane.xlu0 %929  ;;  %v1729_v35 = vrot.slane %v1026_v23, %v3129_v27 }
  0xf6   : > { %v1571_v36 = vrot.slane %v930_v24, %v3129_v27 }
  0xf7   : > { %1148 = vadd.xlane.f32.xlu1 %v1147_v25  ;;  %v810_v25 = vld [vmem:[%s2971_s9 + $0x1d8] sm:$0xff] }
  0xf8   : > { %1097 = vadd.xlane.f32.xlu0 %v1096_v26  ;;  %v1029_v31 = vpop.xlane.xlu1 %1028  ;;  %v793_v26 = vld [vmem:[%s2971_s9 + $0x150] sm:$0xff] }
  0xf9   : > { %v933_v32 = vpop.xlane.xlu0 %932  ;;  %v1733_v37 = vrot.slane %v1029_v31, %v3132_v28 }
  0xfa   : > { %v1575_v38 = vrot.slane %v933_v32, %v3132_v28 }
  0xfb   : > { %v1734_v41 = vsel %vm1468_vm1, %v1733_v37, %v1729_v35  ;;  %1244 = vadd.xlane.f32.xlu1 %v1243_v33  ;;  %v1057_v33 = vsel %vm879_vm0, %v810_v25, 0.0  ;;  %v842_v37 = vld [vmem:[%s2971_s9 + $0x2d8] sm:$0xff] }
  0xfc   : > { %v1576_v42 = vsel %vm1468_vm1, %v1575_v38, %v1571_v36  ;;  %1193 = vadd.xlane.f32.xlu0 %v1192_v34  ;;  %v1125_v43 = vpop.xlane.xlu1 %1124  ;;  %v1006_v34 = vsel %vm879_vm0, %v793_v26, 0.0  ;;  %v825_v38 = vld [vmem:[%s2971_s9 + $0x250] sm:$0xff]  ;;  %v858_v25 = vld [vmem:[%s2971_s9 + $0x358] sm:$0xff]  ;;  %v1484_v26 = vadd.s32 4294967264, %v3116_v16 }
  0xfd   : > { %v1122_v44 = vpop.xlane.xlu0 %1121  ;;  %v1891_v47 = vrot.slane %v1125_v43, %v3132_v28  ;;  %v1102_v43 = vsel %vm879_vm0, %v825_v38, 0.0  ;;  %v780_v38 = vld [vmem:[%s2971_s9 + $0xe8] sm:$0xff] }
  0xfe   : > { %v1887_v48 = vrot.slane %v1122_v44, %v3129_v27 }
  0xff   : > { %959 = vadd.xlane.f32.xlu1 %v958_v45  ;;  %v874_v45 = vld [vmem:[%s2971_s9 + $0x3d8] sm:$0xff] }
 0x100   : > { %v3153_v51 = vsel %vm1468_vm1, %v1891_v47, %v1887_v48  ;;  %908 = vadd.xlane.f32.xlu0 %v907_v46  ;;  %v1221_v52 = vpop.xlane.xlu1 %1220  ;;  %v857_v46 = vld [vmem:[%s2971_s9 + $0x350] sm:$0xff]  ;;  %v1477_v47 = vadd.s32 4294967272, %v3116_v16 }
 0x101   : > { %v1218_v53 = vpop.xlane.xlu0 %1217  ;;  %v2049_v56 = vrot.slane %v1221_v52, %v3132_v28  ;;  %v1249_v52 = vsel %vm879_vm0, %v874_v45, 0.0 }
 0x102   : > { %v2045_v57 = vrot.slane %v1218_v53, %v3129_v27  ;;  %v1198_v53 = vsel %vm879_vm0, %v857_v46, 0.0 }
 0x103   : > { %1055 = vadd.xlane.f32.xlu1 %v1054_v54 }
 0x104   : > { %v3163_v61 = vsel %vm1468_vm1, %v2049_v56, %v2045_v57  ;;  %1004 = vadd.xlane.f32.xlu0 %v1003_v55  ;;  %v885_v62 = vpop.xlane.xlu1 %884  ;;  %v3215_v57 = vsub.s32 %v1477_v47, %v3120_v19  ;;  %v812_v47 = vld [vmem:[%s2971_s9 + $0x1e8] sm:$0xff] }
 0x105   : > { %v882_v63 = vpop.xlane.xlu0 %881  ;;  %v1467_v2 = vrot.slane %v885_v62, %v3132_v28 }
 0x106   : > { %v1462_v3 = vrot.slane %v882_v63, %v3129_v27 }
 0x107   : > { %1151 = vadd.xlane.f32.xlu1 %v1150_v0 }
 0x108   : > { %v3175_v7 = vsel %vm1468_vm1, %v1467_v2, %v1462_v3  ;;  %1100 = vadd.xlane.f32.xlu0 %v1099_v1  ;;  %v978_v8 = vpop.xlane.xlu1 %977  ;;  %v811_v2 = vld [vmem:[%s2971_s9 + $0x1e0] sm:$0xff]  ;;  %v794_v3 = vld [vmem:[%s2971_s9 + $0x158] sm:$0xff] }
 0x109   : > { %v936_v9 = vpop.xlane.xlu0 %935  ;;  %v1650_v22 = vrot.slane %v978_v8, %v3129_v27 }
 0x10a   : > { %v1580_v12 = vrot.slane %v936_v9, %v3170_v4  ;;  %v1060_v9 = vsel %vm879_vm0, %v811_v2, 0.0 }
 0x10b   : > { %1247 = vadd.xlane.f32.xlu1 %v1246_v10  ;;  %v1009_v10 = vsel %vm879_vm0, %v794_v3, 0.0  ;;  %v876_v3 = vld [vmem:[%s2971_s9 + $0x3e8] sm:$0xff] }
 0x10c   : > { %v1581_v15 = vsel %vm1475_vm2, %v1580_v12, %v1576_v42  ;;  %1196 = vadd.xlane.f32.xlu0 %v1195_v11  ;;  %v1032_v17 = vpop.xlane.xlu1 %1031  ;;  %v1153_v42 = vsel %vm879_vm0, %v842_v37, 0.0  ;;  %v3254_v37 = vsub.s32 %v1484_v26, %v3120_v19  ;;  %v813_v26 = vld [vmem:[%s2971_s9 + $0x1f0] sm:$0xff] }
 0x10d   : > { %v981_v18 = vpop.xlane.xlu0 %980  ;;  %v1738_v23 = vrot.slane %v1032_v17, %v3170_v4 }
 0x10e   : > { %v1654_v24 = vrot.slane %v981_v18, %v3132_v28 }
 0x10f   : > { %v1739_v29 = vsel %vm1475_vm2, %v1738_v23, %v1734_v41  ;;  %962 = vadd.xlane.f32.xlu1 %v961_v20  ;;  %v1156_v20 = vsel %vm879_vm0, %v843_v13, 0.0 }
 0x110   : > { %v1655_v30 = vsel %vm1468_vm1, %v1654_v24, %v1650_v22  ;;  %911 = vadd.xlane.f32.xlu0 %v910_v21  ;;  %v1077_v31 = vpop.xlane.xlu1 %1076  ;;  %v1105_v21 = vsel %vm879_vm0, %v826_v14, 0.0  ;;  %v875_v24 = vld [vmem:[%s2971_s9 + $0x3e0] sm:$0xff] }
 0x111   : > { %v1074_v32 = vpop.xlane.xlu0 %1073  ;;  %v1812_v35 = vrot.slane %v1077_v31, %v3132_v28 }
 0x112   : > { %v1808_v36 = vrot.slane %v1074_v32, %v3129_v27 }
 0x113   : > { %1058 = vadd.xlane.f32.xlu1 %v1057_v33  ;;  %v1252_v33 = vsel %vm879_vm0, %v875_v24, 0.0 }
 0x114   : > { %v3199_v39 = vsel %vm1468_vm1, %v1812_v35, %v1808_v36  ;;  %1007 = vadd.xlane.f32.xlu0 %v1006_v34  ;;  %v1170_v40 = vpop.xlane.xlu1 %1169  ;;  %v1201_v34 = vsel %vm879_vm0, %v858_v25, 0.0 }
 0x115   : > { %v1128_v41 = vpop.xlane.xlu0 %1127  ;;  %v1966_v54 = vrot.slane %v1170_v40, %v3129_v27  ;;  %v763_v40 = vld [vmem:[%s2971_s9 + $0x60] sm:$0xff] }
 0x116   : > { %v1896_v44 = vrot.slane %v1128_v41, %v3170_v4 }
 0x117   : > { %1154 = vadd.xlane.f32.xlu1 %v1153_v42 }
 0x118   : > { %v1897_v48 = vsel %vm1475_vm2, %v1896_v44, %v3153_v51  ;;  %1103 = vadd.xlane.f32.xlu0 %v1102_v43  ;;  %v1224_v49 = vpop.xlane.xlu1 %1223  ;;  %v779_v51 = vld [vmem:[%s2971_s9 + $0xe0] sm:$0xff]  ;;  %v967_v44 = vsel %vm879_vm0, %v780_v38, 0.0 }
 0x119   : > { %v1173_v50 = vpop.xlane.xlu0 %1172  ;;  %v2054_v55 = vrot.slane %v1224_v49, %v3170_v4  ;;  %v964_v63 = vsel %vm879_vm0, %v779_v51, 0.0 }
 0x11a   : > { %v1970_v56 = vrot.slane %v1173_v50, %v3132_v28  ;;  %v913_v28 = vsel %vm879_vm0, %v762_v58, 0.0  ;;  %v844_v58 = vld [vmem:[%s2971_s9 + $0x2e8] sm:$0xff] }
 0x11b   : > { %v2055_v59 = vsel %vm1475_vm2, %v2054_v55, %v3163_v61  ;;  %1250 = vadd.xlane.f32.xlu1 %v1249_v52 }
 0x11c   : > { %v1971_v60 = vsel %vm1468_vm1, %v1970_v56, %v1966_v54  ;;  %1199 = vadd.xlane.f32.xlu0 %v1198_v53  ;;  %v939_v27 = vpop.xlane.xlu1 %938  ;;  %v1063_v54 = vsel %vm879_vm0, %v812_v47, 0.0 }
 0x11d   : > { %v888_v62 = vpop.xlane.xlu0 %887  ;;  %v1585_v0 = vrot.slane %v939_v27, %v3215_v57 }
 0x11e   : > { %v1474_v1 = vrot.slane %v888_v62, %v3170_v4 }
 0x11f   : > { %v1586_v61 = vsel %vm1482_vm3, %v1585_v0, %v1581_v15  ;;  %965 = vadd.xlane.f32.xlu1 %v964_v63 }
 0x120   : > { %v1476_v5 = vsel %vm1475_vm2, %v1474_v1, %v3175_v7  ;;  %914 = vadd.xlane.f32.xlu0 %v913_v28  ;;  %v1035_v6 = vpop.xlane.xlu1 %1034  ;;  %v1159_v28 = vsel %vm879_vm0, %v844_v58, 0.0 }
 0x121   : > { %v984_v8 = vpop.xlane.xlu0 %983  ;;  %v1743_v11 = vrot.slane %v1035_v6, %v3215_v57 }
 0x122   : > { %v1659_v12 = vrot.slane %v984_v8, %v3170_v4 }
 0x123   : > { %v1744_v15 = vsel %vm1482_vm3, %v1743_v11, %v1739_v29  ;;  %1061 = vadd.xlane.f32.xlu1 %v1060_v9  ;;  %v1255_v11 = vsel %vm879_vm0, %v876_v3, 0.0 }
 0x124   : > { %v1660_v7 = vsel %vm1475_vm2, %v1659_v12, %v1655_v30  ;;  %1010 = vadd.xlane.f32.xlu0 %v1009_v10  ;;  %v1131_v17 = vpop.xlane.xlu1 %1130 }
 0x125   : > { %v1080_v18 = vpop.xlane.xlu0 %1079  ;;  %v1901_v22 = vrot.slane %v1131_v17, %v3215_v57  ;;  %v764_v17 = vld [vmem:[%s2971_s9 + $0x68] sm:$0xff] }
 0x126   : > { %v1817_v23 = vrot.slane %v1080_v18, %v3170_v4 }
 0x127   : > { %v1902_v29 = vsel %vm1482_vm3, %v1901_v22, %v1897_v48  ;;  %1157 = vadd.xlane.f32.xlu1 %v1156_v20  ;;  %v795_v48 = vld [vmem:[%s2971_s9 + $0x160] sm:$0xff] }
 0x128   : > { %v1818_v30 = vsel %vm1475_vm2, %v1817_v23, %v3199_v39  ;;  %1106 = vadd.xlane.f32.xlu0 %v1105_v21  ;;  %v1227_v31 = vpop.xlane.xlu1 %1226  ;;  %v1012_v55 = vsel %vm879_vm0, %v795_v48, 0.0  ;;  %v877_v48 = vld [vmem:[%s2971_s9 + $0x3f0] sm:$0xff] }
 0x129   : > { %v1176_v32 = vpop.xlane.xlu0 %1175  ;;  %v2059_v35 = vrot.slane %v1227_v31, %v3215_v57 }
 0x12a   : > { %v1975_v36 = vrot.slane %v1176_v32, %v3170_v4  ;;  %v916_v4 = vsel %vm879_vm0, %v763_v40, 0.0  ;;  %v845_v40 = vld [vmem:[%s2971_s9 + $0x2f0] sm:$0xff] }
 0x12b   : > { %v2060_v39 = vsel %vm1482_vm3, %v2059_v35, %v2055_v59  ;;  %1253 = vadd.xlane.f32.xlu1 %v1252_v33  ;;  %v827_v59 = vld [vmem:[%s2971_s9 + $0x260] sm:$0xff] }
 0x12c   : > { %v1976_v41 = vsel %vm1475_vm2, %v1975_v36, %v1971_v60  ;;  %1202 = vadd.xlane.f32.xlu0 %v1201_v34  ;;  %v942_v42 = vpop.xlane.xlu1 %941  ;;  %v1108_v0 = vsel %vm879_vm0, %v827_v59, 0.0  ;;  %v1066_v34 = vsel %vm879_vm0, %v813_v26, 0.0  ;;  %v1265_v26 = vld [vmem:[%s2969_s8] sm:$0xff] }
 0x12d   : > { %v891_v43 = vpop.xlane.xlu0 %890  ;;  %v1590_v45 = vrot.slane %v942_v42, %v3254_v37 }
 0x12e   : > { %v1481_v46 = vrot.slane %v891_v43, %v3215_v57 }
 0x12f   : > { %v1591_v49 = vsel %vm1489_vm4, %v1590_v45, %v1586_v61  ;;  %968 = vadd.xlane.f32.xlu1 %v967_v44  ;;  %v859_v61 = vld [vmem:[%s2971_s9 + $0x360] sm:$0xff] }
 0x130   : > { %v1483_v50 = vsel %vm1482_vm3, %v1481_v46, %v1476_v5  ;;  %917 = vadd.xlane.f32.xlu0 %v916_v4  ;;  %v1038_v52 = vpop.xlane.xlu1 %1037  ;;  %v1491_v5 = vadd.s32 4294967256, %v3116_v16  ;;  %v1204_v12 = vsel %vm879_vm0, %v859_v61, 0.0  ;;  %v1162_v4 = vsel %vm879_vm0, %v845_v40, 0.0 }
 0x131   : > { %v987_v53 = vpop.xlane.xlu0 %986  ;;  %v1748_v56 = vrot.slane %v1038_v52, %v3254_v37 }
 0x132   : > { %v1664_v51 = vrot.slane %v987_v53, %v3215_v57 }
 0x133   : > { %v1749_v60 = vsel %vm1489_vm4, %v1748_v56, %v1744_v15  ;;  %1064 = vadd.xlane.f32.xlu1 %v1063_v54  ;;  %v3290_v15 = vsub.s32 %v1491_v5, %v3120_v19  ;;  %v1258_v56 = vsel %vm879_vm0, %v877_v48, 0.0  ;;  %v814_v5 = vld [vmem:[%s2971_s9 + $0x1f8] sm:$0xff] }
 0x134   : > { %v1665_v27 = vsel %vm1482_vm3, %v1664_v51, %v1660_v7  ;;  %1013 = vadd.xlane.f32.xlu0 %v1012_v55  ;;  %v1134_v62 = vpop.xlane.xlu1 %1133  ;;  %v781_v7 = vld [vmem:[%s2971_s9 + $0xf0] sm:$0xff] }
 0x135   : > { %v1083_v63 = vpop.xlane.xlu0 %1082  ;;  %v1906_v1 = vrot.slane %v1134_v62, %v3254_v37  ;;  %v970_v23 = vsel %vm879_vm0, %v781_v7, 0.0  ;;  %v765_v62 = vld [vmem:[%s2971_s9 + $0x70] sm:$0xff] }
 0x136   : > { %v1822_v2 = vrot.slane %v1083_v63, %v3215_v57 }
 0x137   : > { %v1907_v6 = vsel %vm1489_vm4, %v1906_v1, %v1902_v29  ;;  %1160 = vadd.xlane.f32.xlu1 %v1159_v28  ;;  %v796_v29 = vld [vmem:[%s2971_s9 + $0x168] sm:$0xff] }
 0x138   : > { %v1823_v8 = vsel %vm1482_vm3, %v1822_v2, %v1818_v30  ;;  %1109 = vadd.xlane.f32.xlu0 %v1108_v0  ;;  %v1230_v9 = vpop.xlane.xlu1 %1229  ;;  %v1015_v35 = vsel %vm879_vm0, %v796_v29, 0.0  ;;  %v1266_v29 = vld [vmem:[%s2969_s8 + $0x8] sm:$0xff] }
 0x139   : > { %v1179_v10 = vpop.xlane.xlu0 %1178  ;;  %v2064_v13 = vrot.slane %v1230_v9, %v3254_v37 }
 0x13a   : > { %v1980_v14 = vrot.slane %v1179_v10, %v3215_v57  ;;  %v919_v57 = vsel %vm879_vm0, %v764_v17, 0.0  ;;  %v846_v17 = vld [vmem:[%s2971_s9 + $0x2f8] sm:$0xff] }
 0x13b   : > { %v2065_v18 = vsel %vm1489_vm4, %v2064_v13, %v2060_v39  ;;  %1256 = vadd.xlane.f32.xlu1 %v1255_v11  ;;  %v828_v39 = vld [vmem:[%s2971_s9 + $0x268] sm:$0xff] }
 0x13c   : > { %v1981_v20 = vsel %vm1482_vm3, %v1980_v14, %v1976_v41  ;;  %1205 = vadd.xlane.f32.xlu0 %v1204_v12  ;;  %v945_v21 = vpop.xlane.xlu1 %944  ;;  %v1111_v45 = vsel %vm879_vm0, %v828_v39, 0.0  ;;  %v1069_v12 = vsel %vm879_vm0, %v814_v5, 0.0  ;;  %v1285_v5 = vld [vmem:[%s2969_s8 + $0xa0] sm:$0xff] }
 0x13d   : > { %v894_v22 = vpop.xlane.xlu0 %893  ;;  %v1595_v24 = vrot.slane %v945_v21, %v3290_v15  ;;  %v1282_v21 = vld [vmem:[%s2969_s8 + $0x88] sm:$0xff] }
 0x13e   : > { %v1488_v25 = vrot.slane %v894_v22, %v3254_v37  ;;  %v1313_v22 = vld [vmem:[%s2969_s8 + $0x180] sm:$0xff] }
 0x13f   : > { %v1596_v30 = vsel %vm1496_vm5, %v1595_v24, %v1591_v49  ;;  %971 = vadd.xlane.f32.xlu1 %v970_v23  ;;  %v860_v49 = vld [vmem:[%s2971_s9 + $0x368] sm:$0xff] }
 0x140   : > { %v1490_v31 = vsel %vm1489_vm4, %v1488_v25, %v1483_v50  ;;  %920 = vadd.xlane.f32.xlu0 %v919_v57  ;;  %v1041_v32 = vpop.xlane.xlu1 %1040  ;;  %v1498_v50 = vadd.s32 4294967248, %v3116_v16  ;;  %v1207_v51 = vsel %vm879_vm0, %v860_v49, 0.0  ;;  %v1314_v25 = vld [vmem:[%s2969_s8 + $0x188] sm:$0xff] }
 0x141   : > { %v990_v33 = vpop.xlane.xlu0 %989  ;;  %v1753_v36 = vrot.slane %v1041_v32, %v3290_v15  ;;  %v1165_v32 = vsel %vm879_vm0, %v846_v17, 0.0 }
 0x142   : > { %v1669_v38 = vrot.slane %v990_v33, %v3254_v37 }
 0x143   : > { %v1754_v41 = vsel %vm1496_vm5, %v1753_v36, %v1749_v60  ;;  %1067 = vadd.xlane.f32.xlu1 %v1066_v34  ;;  %v3330_v60 = vsub.s32 %v1498_v50, %v3120_v19  ;;  %v2486_v34 = vpack.c.bf16 %v1314_v25, %v1313_v22  ;;  %v1297_v36 = vld [vmem:[%s2969_s8 + $0x100] sm:$0xff]  ;;  %v1316_v50 = vld [vmem:[%s2969_s8 + $0x198] sm:$0xff] }
 0x144   : > { %v1670_v42 = vsel %vm1489_vm4, %v1669_v38, %v1665_v27  ;;  %1016 = vadd.xlane.f32.xlu0 %v1015_v35  ;;  %v1137_v43 = vpop.xlane.xlu1 %1136  ;;  %v782_v27 = vld [vmem:[%s2971_s9 + $0xf8] sm:$0xff]  ;;  %v2456_v35 = vpack.c.bf16 %v1266_v29, %v1265_v26  ;;  %v1298_v38 = vld [vmem:[%s2969_s8 + $0x108] sm:$0xff] }
 0x145   : > { %v1086_v44 = vpop.xlane.xlu0 %1085  ;;  %v1911_v46 = vrot.slane %v1137_v43, %v3290_v15  ;;  %v973_v2 = vsel %vm879_vm0, %v782_v27, 0.0  ;;  %v1505_v43 = vadd.s32 4294967240, %v3116_v16  ;;  %2487 = vmatprep.subr.bf16.mxu1 %v2486_v34  ;;  %v1301_v22 = vld [vmem:[%s2969_s8 + $0x120] sm:$0xff]  ;;  %v1319_v34 = vld [vmem:[%s2969_s8 + $0x1b0] sm:$0xff] }
 0x146   : > { %v1827_v47 = vrot.slane %v1086_v44, %v3254_v37  ;;  %v2488_v44 = vpack.c.bf16 %v1298_v38, %v1297_v36  ;;  %v862_v29 = vld [vmem:[%s2971_s9 + $0x378] sm:$0xff] }
 0x147   : > { %v3320_v52 = vsel %vm1496_vm5, %v1911_v46, %v1907_v6  ;;  %1163 = vadd.xlane.f32.xlu1 %v1162_v4  ;;  %v797_v6 = vld [vmem:[%s2971_s9 + $0x170] sm:$0xff] }
 0x148   : > { %v3323_v53 = vsel %vm1489_vm4, %v1827_v47, %v1823_v8  ;;  %1112 = vadd.xlane.f32.xlu0 %v1111_v45  ;;  %v1233_v54 = vpop.xlane.xlu1 %1232  ;;  %v1018_v13 = vsel %vm879_vm0, %v797_v6, 0.0  ;;  %v1283_v4 = vld [vmem:[%s2969_s8 + $0x90] sm:$0xff]  ;;  %v1284_v45 = vld [vmem:[%s2969_s8 + $0x98] sm:$0xff]  ;;  %2489 = vmatpush3.bf16.msra.mxu1 %v2488_v44  ;;  %v1286_v6 = vld [vmem:[%s2969_s8 + $0xa8] sm:$0xff] }
 0x149   : > { %v1182_v55 = vpop.xlane.xlu0 %1181  ;;  %v2069_v58 = vrot.slane %v1233_v54, %v3290_v15  ;;  %v1315_v46 = vld [vmem:[%s2969_s8 + $0x190] sm:$0xff]  ;;  %v2458_v49 = vpack.c.bf16 %v1284_v45, %v1283_v4 }
 0x14a   : > { %v1985_v59 = vrot.slane %v1182_v55, %v3254_v37  ;;  %v922_v37 = vsel %vm879_vm0, %v765_v62, 0.0  ;;  %v1267_v54 = vld [vmem:[%s2969_s8 + $0x10] sm:$0xff]  ;;  %v1268_v55 = vld [vmem:[%s2969_s8 + $0x18] sm:$0xff] }
 0x14b   : > { %v3335_v63 = vsel %vm1496_vm5, %v2069_v58, %v2065_v18  ;;  %1259 = vadd.xlane.f32.xlu1 %v1258_v56  ;;  %v829_v18 = vld [vmem:[%s2971_s9 + $0x270] sm:$0xff]  ;;  %v2460_v27 = vpack.c.bf16 %v1268_v55, %v1267_v54  ;;  %v1289_v55 = vld [vmem:[%s2969_s8 + $0xc0] sm:$0xff] }
 0x14c   : > { %v3338_v28 = vsel %vm1489_vm4, %v1985_v59, %v1981_v20  ;;  %1208 = vadd.xlane.f32.xlu0 %v1207_v51  ;;  %v948_v0 = vpop.xlane.xlu1 %947  ;;  %v1281_v20 = vld [vmem:[%s2969_s8 + $0x80] sm:$0xff]  ;;  %v1114_v33 = vsel %vm879_vm0, %v829_v18, 0.0  ;;  %v1299_v62 = vld [vmem:[%s2969_s8 + $0x110] sm:$0xff] }
 0x14d   : > { %v897_v1 = vpop.xlane.xlu0 %896  ;;  %v1600_v3 = vrot.slane %v948_v0, %v3330_v60  ;;  %v2454_v24 = vpack.c.bf16 %v1282_v21, %v1281_v20  ;;  %v798_v59 = vld [vmem:[%s2971_s9 + $0x178] sm:$0xff]  ;;  %v1303_v45 = vld [vmem:[%s2969_s8 + $0x130] sm:$0xff] }
 0x14e   : > { %v1495_v61 = vrot.slane %v897_v1, %v3290_v15  ;;  %v1300_v0 = vld [vmem:[%s2969_s8 + $0x118] sm:$0xff] }
 0x14f   : > { %v3347_v8 = vsel %vm1503_vm6, %v1600_v3, %v1596_v30  ;;  %974 = vadd.xlane.f32.xlu1 %v973_v2  ;;  %2455 = vmatprep.subr.bf16.mxu0 %v2454_v24  ;;  %v766_v3 = vld [vmem:[%s2971_s9 + $0x78] sm:$0xff]  ;;  %v1302_v24 = vld [vmem:[%s2969_s8 + $0x128] sm:$0xff] }
 0x150   : > { %v3350_v9 = vsel %vm1496_vm5, %v1495_v61, %v1490_v31  ;;  %923 = vadd.xlane.f32.xlu0 %v922_v37  ;;  %v1044_v10 = vpop.xlane.xlu1 %1043  ;;  %2457 = vmatpush3.bf16.msra.mxu0 %v2456_v35  ;;  %v3401_v37 = vsub.s32 %v1505_v43, %v3120_v19  ;;  %v2492_v61 = vpack.c.bf16 %v1300_v0, %v1299_v62  ;;  %v925_v18 = vsel %vm879_vm0, %v766_v3, 0.0  ;;  %v1274_v62 = vld [vmem:[%s2969_s8 + $0x48] sm:$0xff]  ;;  %v1305_v3 = vld [vmem:[%s2969_s8 + $0x140] sm:$0xff] }
 0x151   : > { %v993_v11 = vpop.xlane.xlu0 %992  ;;  %v1758_v14 = vrot.slane %v1044_v10, %v3330_v60  ;;  %2459 = vmatprep.subr.bf16.mxu0 %v2458_v49  ;;  %v1317_v10 = vld [vmem:[%s2969_s8 + $0x1a0] sm:$0xff] }
 0x152   : > { %v1674_v7 = vrot.slane %v993_v11, %v3290_v15 }
 0x153   : > { %v3362_v23 = vsel %vm1503_vm6, %v1758_v14, %v1754_v41  ;;  %1070 = vadd.xlane.f32.xlu1 %v1069_v12  ;;  %v878_v41 = vld [vmem:[%s2971_s9 + $0x3f8] sm:$0xff]  ;;  %v1021_v12 = vsel %vm879_vm0, %v798_v59, 0.0 }
 0x154   : > { %v3365_v57 = vsel %vm1496_vm5, %v1674_v7, %v1670_v42  ;;  %1019 = vadd.xlane.f32.xlu0 %v1018_v13  ;;  %v1140_v30 = vpop.xlane.xlu1 %1139  ;;  %v861_v42 = vld [vmem:[%s2971_s9 + $0x370] sm:$0xff]  ;;  %v1261_v58 = vsel %vm879_vm0, %v878_v41, 0.0  ;;  %2461 = vmatpush3.bf16.msra.mxu0 %v2460_v27  ;;  %v1318_v13 = vld [vmem:[%s2969_s8 + $0x1a8] sm:$0xff]  ;;  %v1269_v14 = vld [vmem:[%s2969_s8 + $0x20] sm:$0xff] }
 0x155   : > { %v1089_v31 = vpop.xlane.xlu0 %1088  ;;  %v1916_v40 = vrot.slane %v1140_v30, %v3330_v60  ;;  %v1270_v7 = vld [vmem:[%s2969_s8 + $0x28] sm:$0xff]  ;;  %v2494_v20 = vpack.c.bf16 %v1318_v13, %v1317_v10  ;;  %v830_v30 = vld [vmem:[%s2971_s9 + $0x278] sm:$0xff] }
 0x156   : > { %v1832_v39 = vrot.slane %v1089_v31, %v3290_v15  ;;  %v2464_v21 = vpack.c.bf16 %v1270_v7, %v1269_v14  ;;  %v2496_v31 = vpack.c.bf16 %v1302_v24, %v1301_v22  ;;  %v1272_v41 = vld [vmem:[%s2969_s8 + $0x38] sm:$0xff]  ;;  %v1117_v44 = vsel %vm879_vm0, %v830_v30, 0.0  ;;  %v1273_v27 = vld [vmem:[%s2969_s8 + $0x40] sm:$0xff]  ;;  %v1323_v14 = vld [vmem:[%s2969_s8 + $0x1d0] sm:$0xff] }
 0x157   : > { %v3384_v47 = vsel %vm1503_vm6, %v1916_v40, %v3320_v52  ;;  %1166 = vadd.xlane.f32.xlu1 %v1165_v32  ;;  %v1210_v52 = vsel %vm879_vm0, %v861_v42, 0.0  ;;  %v1287_v32 = vld [vmem:[%s2969_s8 + $0xb0] sm:$0xff]  ;;  %v1320_v40 = vld [vmem:[%s2969_s8 + $0x1b8] sm:$0xff] }
 0x158   : > { %v3388_v48 = vsel %vm1496_vm5, %v1832_v39, %v3323_v53  ;;  %1115 = vadd.xlane.f32.xlu0 %v1114_v33  ;;  %v1236_v56 = vpop.xlane.xlu1 %1235  ;;  %v2490_v53 = vpack.c.bf16 %v1316_v50, %v1315_v46  ;;  %v1288_v33 = vld [vmem:[%s2969_s8 + $0xb8] sm:$0xff]  ;;  %v1271_v39 = vld [vmem:[%s2969_s8 + $0x30] sm:$0xff] }
 0x159   : > { %v1185_v51 = vpop.xlane.xlu0 %1184  ;;  %v2074_v1 = vrot.slane %v1236_v56, %v3330_v60  ;;  %v2466_v38 = vpack.c.bf16 %v1288_v33, %v1287_v32  ;;  %v2468_v4 = vpack.c.bf16 %v1272_v41, %v1271_v39  ;;  %v1304_v46 = vld [vmem:[%s2969_s8 + $0x138] sm:$0xff]  ;;  %v1290_v56 = vld [vmem:[%s2969_s8 + $0xc8] sm:$0xff]  ;;  %v1293_v32 = vld [vmem:[%s2969_s8 + $0xe0] sm:$0xff] }
 0x15a   : > { %v1990_v2 = vrot.slane %v1185_v51, %v3290_v15  ;;  %2491 = vmatprep.subr.bf16.mxu1 %v2490_v53  ;;  %v2500_v54 = vpack.c.bf16 %v1304_v46, %v1303_v45  ;;  %v1321_v51 = vld [vmem:[%s2969_s8 + $0x1c0] sm:$0xff]  ;;  %v2470_v59 = vpack.c.bf16 %v1290_v56, %v1289_v55  ;;  %v1322_v53 = vld [vmem:[%s2969_s8 + $0x1c8] sm:$0xff]  ;;  %v1292_v13 = vld [vmem:[%s2969_s8 + $0xd8] sm:$0xff] }
 0x15b   : > { %v3409_v11 = vsel %vm1503_vm6, %v2074_v1, %v3335_v63  ;;  %1262 = vadd.xlane.f32.xlu1 %v1261_v58  ;;  %2493 = vmatpush3.bf16.msra.mxu1 %v2492_v61  ;;  %v1294_v33 = vld [vmem:[%s2969_s8 + $0xe8] sm:$0xff] }
 0x15c   : > { %v3413_v15 = vsel %vm1496_vm5, %v1990_v2, %v3338_v28  ;;  %1211 = vadd.xlane.f32.xlu0 %v1210_v52  ;;  %v951_v17 = vpop.xlane.xlu1 %950  ;;  %v2462_v28 = vpack.c.bf16 %v1286_v6, %v1285_v5  ;;  %2495 = vmatprep.subr.bf16.mxu1 %v2494_v20  ;;  %v2502_v2 = vpack.c.bf16 %v1322_v53, %v1321_v51  ;;  %v1512_v6 = vadd.s32 4294967232, %v3116_v16  ;;  %v1276_v20 = vld [vmem:[%s2969_s8 + $0x58] sm:$0xff]  ;;  %v1326_v41 = vld [vmem:[%s2969_s8 + $0x1e8] sm:$0xff]  ;;  %v1279_v53 = vld [vmem:[%s2969_s8 + $0x70] sm:$0xff] }
 0x15d   : > { %v900_v63 = vpop.xlane.xlu0 %899  ;;  %v1605_v25 = vrot.slane %v951_v17, %v3401_v37  ;;  %v2478_v39 = vpack.c.bf16 %v1294_v33, %v1293_v32 }
 0x15e   : > { %v1502_v26 = vrot.slane %v900_v63, %v3330_v60  ;;  %2463 = vmatprep.subr.bf16.mxu0 %v2462_v28  ;;  %v1275_v28 = vld [vmem:[%s2969_s8 + $0x50] sm:$0xff]  ;;  %v3484_v30 = vsub.s32 %v1512_v6, %v3120_v19 }
 0x15f   : > { %v3431_v35 = vsel %vm1510_vm7, %v1605_v25, %v3347_v8  ;;  %1022 = vadd.xlane.f32.xlu1 %v1021_v12  ;;  %v1213_v8 = vsel %vm879_vm0, %v862_v29, 0.0  ;;  %2465 = vmatpush3.bf16.msra.mxu0 %v2464_v21  ;;  %v1291_v12 = vld [vmem:[%s2969_s8 + $0xd0] sm:$0xff]  ;;  %v2476_v25 = vpack.c.bf16 %v1276_v20, %v1275_v28  ;;  %vm2121_vm0 = vcmask 1041409  }
 0x160   : > { %v3435_v36 = vsel %vm1503_vm6, %v1502_v26, %v3350_v9  ;;  %926 = vadd.xlane.f32.xlu0 %v925_v18  ;;  %v1047_v42 = vpop.xlane.xlu1 %1046  ;;  %2497 = vmatpush3.bf16.msra.mxu1 %v2496_v31  ;;  %v2498_v9 = vpack.c.bf16 %v1320_v40, %v1319_v34  ;;  %v2474_v63 = vpack.c.bf16 %v1292_v13, %v1291_v12  ;;  %v1324_v18 = vld [vmem:[%s2969_s8 + $0x1d8] sm:$0xff]  ;;  %v1325_v34 = vld [vmem:[%s2969_s8 + $0x1e0] sm:$0xff] }
 0x161   : > { %v996_v43 = vpop.xlane.xlu0 %995  ;;  %v1763_v49 = vrot.slane %v1047_v42, %v3401_v37  ;;  %2467 = vmatprep.subr.bf16.mxu0 %v2466_v38  ;;  %v2506_v24 = vpack.c.bf16 %v1324_v18, %v1323_v14  ;;  %v1308_v26 = vld [vmem:[%s2969_s8 + $0x158] sm:$0xff]  ;;  %v1278_v42 = vld [vmem:[%s2969_s8 + $0x68] sm:$0xff]  ;;  %v1519_v14 = vadd.s32 4294967224, %v3116_v16 }
 0x162   : > { %v1679_v50 = vrot.slane %v996_v43, %v3330_v60  ;;  %2499 = vmatprep.subr.bf16.mxu1 %v2498_v9 }
 0x163   : > { %v3451_v58 = vsel %vm1510_vm7, %v1763_v49, %v3362_v23  ;;  %1214 = vadd.xlane.f32.xlu1 %v1213_v8  ;;  %2469 = vmatpush3.bf16.msra.mxu0 %v2468_v4  ;;  %v2472_v23 = vpack.c.bf16 %v1274_v62, %v1273_v27  ;;  %v1310_v4 = vld [vmem:[%s2969_s8 + $0x168] sm:$0xff]  ;;  %v1295_v49 = vld [vmem:[%s2969_s8 + $0xf0] sm:$0xff]  ;;  %v1280_v27 = vld [vmem:[%s2969_s8 + $0x78] sm:$0xff] }
 0x164   : > { %v3455_v52 = vsel %vm1503_vm6, %v1679_v50, %v3365_v57  ;;  %1118 = vadd.xlane.f32.xlu0 %v1117_v44  ;;  %v1143_v0 = vpop.xlane.xlu1 %1142  ;;  %2501 = vmatpush3.bf16.msra.mxu1 %v2500_v54  ;;  %v1306_v57 = vld [vmem:[%s2969_s8 + $0x148] sm:$0xff]  ;;  %v2510_v44 = vpack.c.bf16 %v1326_v41, %v1325_v34  ;;  %v1296_v50 = vld [vmem:[%s2969_s8 + $0xf8] sm:$0xff]  ;;  %v1327_v54 = vld [vmem:[%s2969_s8 + $0x1f0] sm:$0xff] }
 0x165   : > { %v1092_v1 = vpop.xlane.xlu0 %1091  ;;  %v1921_v61 = vrot.slane %v1143_v0, %v3401_v37  ;;  %2471 = vmatprep.subr.bf16.mxu0 %v2470_v59  ;;  %v2504_v10 = vpack.c.bf16 %v1306_v57, %v1305_v3  ;;  %2503 = vmatprep.subr.bf16.mxu1 %v2502_v2  ;;  %v2482_v51 = vpack.c.bf16 %v1296_v50, %v1295_v49  ;;  %v1328_v59 = vld [vmem:[%s2969_s8 + $0x1f8] sm:$0xff] }
 0x166   : > { %v1837_v5 = vrot.slane %v1092_v1, %v3330_v60  ;;  %v2514_v1 = vpack.c.bf16 %v1328_v59, %v1327_v54  ;;  %v2484_v2 = vpack.c.bf16 %v1280_v27, %v1279_v53  ;;  %v1312_v3 = vld [vmem:[%s2969_s8 + $0x178] sm:$0xff] }
 0x167   : > { %v3470_v7 = vsel %vm1510_vm7, %v1921_v61, %v3384_v47  ;;  %2473 = vmatpush3.bf16.msra.mxu0 %v2472_v23  ;;  %v1307_v47 = vld [vmem:[%s2969_s8 + $0x150] sm:$0xff] }
 0x168   : > { %v3474_v17 = vsel %vm1503_vm6, %v1837_v5, %v3388_v48  ;;  %v1239_v21 = vpop.xlane.xlu1 %1238  ;;  %2505 = vmatpush3.bf16.msra.mxu1 %v2504_v10  ;;  %2475 = vmatprep.subr.bf16.mxu0 %v2474_v63  ;;  %v2508_v31 = vpack.c.bf16 %v1308_v26, %v1307_v47  ;;  %v1311_v23 = vld [vmem:[%s2969_s8 + $0x170] sm:$0xff] }
 0x169   : > { %v1188_v22 = vpop.xlane.xlu0 %1187  ;;  %v2079_v48 = vrot.slane %v1239_v21, %v3401_v37  ;;  %2507 = vmatprep.subr.bf16.mxu1 %v2506_v24  ;;  %v1522_v21 = vsub.s32 %v1519_v14, %v3120_v19 }
 0x16a   : > { %v1995_v29 = vrot.slane %v1188_v22, %v3330_v60  ;;  %v1277_v60 = vld [vmem:[%s2969_s8 + $0x60] sm:$0xff] }
 0x16b   : > { %v2080_v38 = vsel %vm1510_vm7, %v2079_v48, %v3409_v11  ;;  %2477 = vmatpush3.bf16.msra.mxu0 %v2476_v25  ;;  %v2480_v9 = vpack.c.bf16 %v1278_v42, %v1277_v60  ;;  %v1309_v11 = vld [vmem:[%s2969_s8 + $0x160] sm:$0xff]  ;;  %v1526_v60 = vadd.s32 4294967216, %v3116_v16 }
 0x16c   : > { %v1996_v40 = vsel %vm1503_vm6, %v1995_v29, %v3413_v15  ;;  %v954_v43 = vpop.xlane.xlu1 %953  ;;  %2509 = vmatpush3.bf16.msra.mxu1 %v2508_v31  ;;  %2479 = vmatprep.subr.bf16.mxu0 %v2478_v39  ;;  %v2512_v46 = vpack.c.bf16 %v1310_v4, %v1309_v11 }
 0x16d   : > { %v903_v8 = vpop.xlane.xlu0 %902  ;;  %v1610_v15 = vrot.slane %v954_v43, %v3484_v30  ;;  %2511 = vmatprep.subr.bf16.mxu1 %v2510_v44  ;;  %v1529_v4 = vsub.s32 %v1526_v60, %v3120_v19 }
 0x16e   : > { %v1509_v45 = vrot.slane %v903_v8, %v3401_v37 }
 0x16f   : > { %v1611_v55 = vsel %vm1517_vm8, %v1610_v15, %v3431_v35  ;;  %2481 = vmatpush3.bf16.msra.mxu0 %v2480_v9  ;;  %v2516_v35 = vpack.c.bf16 %v1312_v3, %v1311_v23  ;;  %v1533_v3 = vadd.s32 4294967208, %v3116_v16 }
 0x170   : > { %v1511_v56 = vsel %vm1510_vm7, %v1509_v45, %v3435_v36  ;;  %v1050_v62 = vpop.xlane.xlu1 %1049  ;;  %2513 = vmatpush3.bf16.msra.mxu1 %v2512_v46  ;;  %2483 = vmatprep.subr.bf16.mxu0 %v2482_v51 }
 0x171   : > { %v999_v0 = vpop.xlane.xlu0 %998  ;;  %v1768_v57 = vrot.slane %v1050_v62, %v3484_v30  ;;  %2515 = vmatprep.subr.bf16.mxu1 %v2514_v1 }
 0x172   : > { %v1684_v61 = vrot.slane %v999_v0, %v3401_v37 }
 0x173   : > { %v1769_v36 = vsel %vm1517_vm8, %v1768_v57, %v3451_v58  ;;  %2485 = vmatpush3.bf16.msra.mxu0 %v2484_v2 }
 0x174   : > { %v1685_v5 = vsel %vm1510_vm7, %v1684_v61, %v3455_v52  ;;  %v1146_v6 = vpop.xlane.xlu1 %1145  ;;  %2517 = vmatpush3.bf16.msra.mxu1 %v2516_v35 }
 0x175   : > { %v1095_v10 = vpop.xlane.xlu0 %1094  ;;  %v1926_v12 = vrot.slane %v1146_v6, %v3484_v30 }
 0x176   : > { %v1842_v13 = vrot.slane %v1095_v10, %v3401_v37  ;;  %v3554_v10 = vsub.s32 %v1533_v3, %v3120_v19 }
 0x177   : > { %v1927_v63 = vsel %vm1517_vm8, %v1926_v12, %v3470_v7 }
 0x178   : > { %v1843_v18 = vsel %vm1510_vm7, %v1842_v13, %v3474_v17  ;;  %v1242_v58 = vpop.xlane.xlu1 %1241 }
 0x179   : > { %v1191_v28 = vpop.xlane.xlu0 %1190  ;;  %v2084_v52 = vrot.slane %v1242_v58, %v3484_v30 }
 0x17a   : > { %v2000_v20 = vrot.slane %v1191_v28, %v3401_v37 }
 0x17b   : > { %v2085_v22 = vsel %vm1517_vm8, %v2084_v52, %v2080_v38 }
 0x17c   : > { %v2001_v24 = vsel %vm1510_vm7, %v2000_v20, %v1996_v40  ;;  %v957_v25 = vpop.xlane.xlu1 %956 }
 0x17d   : > { %v906_v47 = vpop.xlane.xlu0 %905  ;;  %v1615_v26 = vrot.slane %v957_v25, %v1522_v21 }
 0x17e   : > { %v1516_v7 = vrot.slane %v906_v47, %v3484_v30 }
 0x17f   : > { %v1616_v17 = vsel %vm1524_vm9, %v1615_v26, %v1611_v55 }
 0x180   : > { %v1518_v48 = vsel %vm1517_vm8, %v1516_v7, %v1511_v56  ;;  %v1053_v29 = vpop.xlane.xlu1 %1052 }
 0x181   : > { %v1002_v31 = vpop.xlane.xlu0 %1001  ;;  %v1773_v32 = vrot.slane %v1053_v29, %v1522_v21 }
 0x182   : > { %v1689_v37 = vrot.slane %v1002_v31, %v3484_v30 }
 0x183   : > { %v1774_v33 = vsel %vm1524_vm9, %v1773_v32, %v1769_v36 }
 0x184   : > { %v1690_v34 = vsel %vm1517_vm8, %v1689_v37, %v1685_v5  ;;  %v1149_v38 = vpop.xlane.xlu1 %1148 }
 0x185   : > { %v1098_v40 = vpop.xlane.xlu0 %1097  ;;  %v1931_v39 = vrot.slane %v1149_v38, %v1522_v21 }
 0x186   : > { %v1847_v41 = vrot.slane %v1098_v40, %v3484_v30 }
 0x187   : > { %v1932_v42 = vsel %vm1524_vm9, %v1931_v39, %v1927_v63 }
 0x188   : > { %v1848_v43 = vsel %vm1517_vm8, %v1847_v41, %v1843_v18  ;;  %v1245_v8 = vpop.xlane.xlu1 %1244 }
 0x189   : > { %v1194_v44 = vpop.xlane.xlu0 %1193  ;;  %v2089_v9 = vrot.slane %v1245_v8, %v1522_v21 }
 0x18a   : > { %v2005_v11 = vrot.slane %v1194_v44, %v3484_v30 }
 0x18b   : > { %v2090_v15 = vsel %vm1524_vm9, %v2089_v9, %v2085_v22 }
 0x18c   : > { %v2006_v45 = vsel %vm1517_vm8, %v2005_v11, %v2001_v24  ;;  %v960_v46 = vpop.xlane.xlu1 %959 }
 0x18d   : > { %v909_v49 = vpop.xlane.xlu0 %908  ;;  %v1620_v50 = vrot.slane %v960_v46, %v1529_v4 }
 0x18e   : > { %v1523_v54 = vrot.slane %v909_v49, %v1522_v21 }
 0x18f   : > { %v1621_v55 = vsel %vm1531_vm10, %v1620_v50, %v1616_v17 }
 0x190   : > { %v1525_v56 = vsel %vm1524_vm9, %v1523_v54, %v1518_v48  ;;  %v1056_v51 = vpop.xlane.xlu1 %1055 }
 0x191   : > { %v1005_v59 = vpop.xlane.xlu0 %1004  ;;  %v1778_v53 = vrot.slane %v1056_v51, %v1529_v4 }
 0x192   : > { %v1694_v27 = vrot.slane %v1005_v59, %v1522_v21 }
 0x193   : > { %v1779_v30 = vsel %vm1531_vm10, %v1778_v53, %v1774_v33  ;;  %v1540_v53 = vadd.s32 4294967200, %v3116_v16 }
 0x194   : > { %v1695_v62 = vsel %vm1524_vm9, %v1694_v27, %v1690_v34  ;;  %v1152_v0 = vpop.xlane.xlu1 %1151  ;;  %v1547_v27 = vadd.s32 4294967192, %v3116_v16 }
 0x195   : > { %v1101_v1 = vpop.xlane.xlu0 %1100  ;;  %v1936_v2 = vrot.slane %v1152_v0, %v1529_v4  ;;  %v1554_v0 = vadd.s32 4294967184, %v3116_v16 }
 0x196   : > { %v1852_v23 = vrot.slane %v1101_v1, %v1522_v21  ;;  %v3622_v1 = vsub.s32 %v1540_v53, %v3120_v19 }
 0x197   : > { %v3550_v57 = vsel %vm1531_vm10, %v1936_v2, %v1932_v42  ;;  %v1561_v2 = vadd.s32 4294967176, %v3116_v16 }
 0x198   : > { %v1853_v61 = vsel %vm1524_vm9, %v1852_v23, %v1848_v43  ;;  %v1248_v35 = vpop.xlane.xlu1 %1247  ;;  %v3626_v23 = vsub.s32 %v1547_v27, %v3120_v19 }
 0x199   : > { %v1197_v36 = vpop.xlane.xlu0 %1196  ;;  %v2094_v5 = vrot.slane %v1248_v35, %v1529_v4 }
 0x19a   : > { %v2010_v6 = vrot.slane %v1197_v36, %v1522_v21  ;;  %v3632_v36 = vsub.s32 %v1554_v0, %v3120_v19 }
 0x19b   : > { %v3557_v12 = vsel %vm1531_vm10, %v2094_v5, %v2090_v15 }
 0x19c   : > { %v2011_v13 = vsel %vm1524_vm9, %v2010_v6, %v2006_v45  ;;  %v963_v14 = vpop.xlane.xlu1 %962  ;;  %v3636_v6 = vsub.s32 %v1561_v2, %v3120_v19 }
 0x19d   : > { %v912_v63 = vpop.xlane.xlu0 %911  ;;  %v1625_v18 = vrot.slane %v963_v14, %v3554_v10 }
 0x19e   : > { %v1530_v58 = vrot.slane %v912_v63, %v1529_v4 }
 0x19f   : > { %v3562_v28 = vsel %vm1538_vm11, %v1625_v18, %v1621_v55 }
 0x1a0   : > { %v1532_v52 = vsel %vm1531_vm10, %v1530_v58, %v1525_v56  ;;  %v1059_v20 = vpop.xlane.xlu1 %1058 }
 0x1a1   : > { %v1008_v21 = vpop.xlane.xlu0 %1007  ;;  %v1783_v22 = vrot.slane %v1059_v20, %v3554_v10 }
 0x1a2   : > { %v1699_v24 = vrot.slane %v1008_v21, %v1529_v4 }
 0x1a3   : > { %v3567_v25 = vsel %vm1538_vm11, %v1783_v22, %v1779_v30 }
 0x1a4   : > { %v3570_v47 = vsel %vm1531_vm10, %v1699_v24, %v1695_v62  ;;  %v1155_v26 = vpop.xlane.xlu1 %1154 }
 0x1a5   : > { %v1104_v7 = vpop.xlane.xlu0 %1103  ;;  %v1941_v35 = vrot.slane %v1155_v26, %v3554_v10 }
 0x1a6   : > { %v1857_v17 = vrot.slane %v1104_v7, %v1529_v4 }
 0x1a7   : > { %v1942_v58 = vsel %vm1538_vm11, %v1941_v35, %v3550_v57 }
 0x1a8   : > { %v3573_v48 = vsel %vm1531_vm10, %v1857_v17, %v1853_v61  ;;  %v3575_v29 = vpop.xlane.xlu1 %1250 }
 0x1a9   : > { %v1200_v31 = vpop.xlane.xlu0 %1199  ;;  %v2099_v20 = vrot.slane %v3575_v29, %v3554_v10 }
 0x1aa   : > { %v2015_v32 = vrot.slane %v1200_v31, %v1529_v4 }
 0x1ac   : > { %v3578_v37 = vsel %vm1531_vm10, %v2015_v32, %v2011_v13  ;;  %v966_v33 = vpop.xlane.xlu1 %965 }
 0x1ad   : > { %v915_v34 = vpop.xlane.xlu0 %914  ;;  %v1630_v5 = vrot.slane %v966_v33, %v3622_v1 }
 0x1ae   : > { %v1537_v38 = vrot.slane %v915_v34, %v3554_v10 }
 0x1af   : > { %v1631_v21 = vsel %vm1545_vm12, %v1630_v5, %v3562_v28 }
 0x1b0   : > { %v3582_v40 = vsel %vm1538_vm11, %v1537_v38, %v1532_v52  ;;  %v3584_v39 = vpop.xlane.xlu1 %1061 }
 0x1b1   : > { %v3586_v41 = vpop.xlane.xlu0 %1010  ;;  %v1788_v22 = vrot.slane %v3584_v39, %v3622_v1 }
 0x1b2   : > { %v1704_v26 = vrot.slane %v3586_v41, %v3554_v10 }
 0x1b4   : > { %v1158_v60 = vpop.xlane.xlu1 %1157 }
 0x1b5   : > { %v3588_v42 = vpop.xlane.xlu0 %1106  ;;  %v1946_v13 = vrot.slane %v1158_v60, %v3622_v1 }
 0x1b7   : > { %v1947_v57 = vsel %vm1545_vm12, %v1946_v13, %v1942_v58 }
 0x1b8   : > { %v3590_v43 = vpop.xlane.xlu1 %1253 }
 0x1b9   : > { %v3592_v8 = vpop.xlane.xlu0 %1202  ;;  %v2104_v7 = vrot.slane %v3590_v43, %v3622_v1  ;;  %v2100_v43 = vsel %vm1538_vm11, %v2099_v20, %v3557_v12 }
 0x1ba   : > { %v2020_v12 = vrot.slane %v3592_v8, %v3554_v10 }
 0x1bc   : > { %v969_v44 = vpop.xlane.xlu1 %968  ;;  %v2021_v58 = vsel %vm1538_vm11, %v2020_v12, %v3578_v37 }
 0x1bd   : > { %v3594_v9 = vpop.xlane.xlu0 %917  ;;  %v1635_v16 = vrot.slane %v969_v44, %v3626_v23 }
 0x1bf   : > { %v1636_v17 = vsel %vm1552_vm13, %v1635_v16, %v1631_v21 }
 0x1c0   : > { %v3596_v11 = vpop.xlane.xlu1 %1064 }
 0x1c1   : > { %v3598_v4 = vpop.xlane.xlu0 %1013  ;;  %v1793_v28 = vrot.slane %v3596_v11, %v3626_v23 }
 0x1c4   : > { %v1161_v15 = vpop.xlane.xlu1 %1160 }
 0x1c5   : > { %v3600_v45 = vpop.xlane.xlu0 %1109  ;;  %v1951_v18 = vrot.slane %v1161_v15, %v3626_v23 }
 0x1c6   : > { %v1867_v8 = vrot.slane %v3600_v45, %v3622_v1 }
 0x1c7   : > { %v1952_v32 = vsel %vm1552_vm13, %v1951_v18, %v1947_v57 }
 0x1c8   : > { %v3602_v46 = vpop.xlane.xlu1 %1256 }
 0x1c9   : > { %v3604_v49 = vpop.xlane.xlu0 %1205  ;;  %v2109_v33 = vrot.slane %v3602_v46, %v3626_v23  ;;  %v1789_v46 = vsel %vm1545_vm12, %v1788_v22, %v3567_v25  ;;  %v1705_v25 = vsel %vm1538_vm11, %v1704_v26, %v3570_v47 }
 0x1ca   : > { %v2025_v47 = vrot.slane %v3604_v49, %v3622_v1 }
 0x1cc   : > { %v972_v50 = vpop.xlane.xlu1 %971 }
 0x1cd   : > { %v3606_v54 = vpop.xlane.xlu0 %920  ;;  %v1640_v52 = vrot.slane %v972_v50, %v3632_v36  ;;  %v1862_v50 = vrot.slane %v3588_v42, %v3554_v10  ;;  %v1544_v42 = vrot.slane %v3594_v9, %v3622_v1  ;;  %v1709_v10 = vrot.slane %v3598_v4, %v3622_v1 }
 0x1ce   : > { %v1551_v9 = vrot.slane %v3606_v54, %v3626_v23 }
 0x1cf   : > { %v1641_v41 = vsel %vm1559_vm14, %v1640_v52, %v1636_v17  ;;  %v1863_v45 = vsel %vm1538_vm11, %v1862_v50, %v3573_v48  ;;  %v1546_v37 = vsel %vm1545_vm12, %v1544_v42, %v3582_v40 }
 0x1d0   : > { %v3608_v55 = vpop.xlane.xlu1 %1067 }
 0x1d1   : > { %v3610_v56 = vpop.xlane.xlu0 %1016  ;;  %v1798_v38 = vrot.slane %v3608_v55, %v3632_v36  ;;  %v2105_v55 = vsel %vm1545_vm12, %v2104_v7, %v2100_v43 }
 0x1d2   : > { %v2110_v0 = vsel %vm1552_vm13, %v2109_v33, %v2105_v55  ;;  %v1714_v16 = vrot.slane %v3610_v56, %v3626_v23  ;;  %v2378_v55 = vld [vmem:[%s3796_s2] ss:$0 sm:$0xff] (!%p2377_p11) }
 0x1d4   : > { %v1164_v51 = vpop.xlane.xlu1 %1163 }
 0x1d5   : > { %v3612_v59 = vpop.xlane.xlu0 %1112  ;;  %v1956_v19 = vrot.slane %v1164_v51, %v3632_v36 }
 0x1d6   : > { %v1872_v52 = vrot.slane %v3612_v59, %v3626_v23  ;;  %v1710_v59 = vsel %vm1545_vm12, %v1709_v10, %v1705_v25 }
 0x1d7   : > { %v1957_v60 = vsel %vm1559_vm14, %v1956_v19, %v1952_v32  ;;  %v1715_v20 = vsel %vm1552_vm13, %v1714_v16, %v1710_v59 }
 0x1d8   : > { %v3616_v30 = vpop.xlane.xlu1 %1259 }
 0x1d9   : > { %v3618_v62 = vpop.xlane.xlu0 %1208  ;;  %v2114_v39 = vrot.slane %v3616_v30, %v3632_v36  ;;  %v1794_v30 = vsel %vm1552_vm13, %v1793_v28, %v1789_v46 }
 0x1da   : > { %v2030_v49 = vrot.slane %v3618_v62, %v3626_v23  ;;  %v1868_v23 = vsel %vm1545_vm12, %v1867_v8, %v1863_v45 }
 0x1db   : > { %v2115_v35 = vsel %vm1559_vm14, %v2114_v39, %v2110_v0 }
 0x1dc   : > { %v975_v3 = vpop.xlane.xlu1 %974 }
 0x1dd   : > { %v3628_v61 = vpop.xlane.xlu0 %923  ;;  %v1645_v24 = vrot.slane %v975_v3, %v3636_v6  ;;  %v1799_v3 = vsel %vm1559_vm14, %v1798_v38, %v1794_v30 }
 0x1de   : > { %v1558_v54 = vrot.slane %v3628_v61, %v3632_v36  ;;  %v2026_v61 = vsel %vm1545_vm12, %v2025_v47, %v2021_v58 }
 0x1df   : > { %v1646_v11 = vsel %vm1566_vm15, %v1645_v24, %v1641_v41  ;;  %v2031_v40 = vsel %vm1552_vm13, %v2030_v49, %v2026_v61 }
 0x1e0   : > { %v1071_v14 = vpop.xlane.xlu1 %1070 }
 0x1e1   : > { %v3640_v63 = vpop.xlane.xlu0 %1019  ;;  %v1803_v44 = vrot.slane %v1071_v14, %v3636_v6 }
 0x1e2   : > { %v1719_v56 = vrot.slane %v3640_v63, %v3632_v36  ;;  %v1553_v63 = vsel %vm1552_vm13, %v1551_v9, %v1546_v37 }
 0x1e3   : > { %v1804_v5 = vsel %vm1566_vm15, %v1803_v44, %v1799_v3  ;;  %v1560_v57 = vsel %vm1559_vm14, %v1558_v54, %v1553_v63 }
 0x1e4   : > { %v1167_v31 = vpop.xlane.xlu1 %1166  ;;  %v1720_v7 = vsel %vm1559_vm14, %v1719_v56, %v1715_v20 }
 0x1e5   : > { %v3660_v29 = vpop.xlane.xlu0 %1115  ;;  %v1961_v34 = vrot.slane %v1167_v31, %v3636_v6 }
 0x1e6   : > { %v1877_v1 = vrot.slane %v3660_v29, %v3632_v36 }
 0x1e7   : > { %v1962_v15 = vsel %vm1566_vm15, %v1961_v34, %v1957_v60 }
 0x1e8   : > { %v1263_v51 = vpop.xlane.xlu1 %1262  ;;  %v2123_v27 = vsel %vm2121_vm0, %v1962_v15, %v1646_v11  ;;  %v1264_v11 = vld [vmem:[#allocation2] sm:$0x3] }
 0x1e9   : > { %v1212_v53 = vpop.xlane.xlu0 %1211  ;;  %v2119_v2 = vrot.slane %v1263_v51, %v3636_v6  ;;  %2194 = vmatprep.mubr.f32.mxu0 %v2123_v27 }
 0x1ea   : > { %v2035_v48 = vrot.slane %v1212_v53, %v3632_v36  ;;  %v1873_v36 = vsel %vm1552_vm13, %v1872_v52, %v1868_v23 }
 0x1eb   : > { %v2120_v13 = vsel %vm1566_vm15, %v2119_v2, %v2115_v35  ;;  %v1878_v17 = vsel %vm1559_vm14, %v1877_v1, %v1873_v36 }
 0x1ec   : > { %v1023_v14 = vpop.xlane.xlu1 %1022  ;;  %v2125_v4 = vsel %vm2121_vm0, %v2120_v13, %v1804_v5  ;;  %v2036_v31 = vsel %vm1559_vm14, %v2035_v48, %v2031_v40 }
 0x1ed   : > { %v927_v18 = vpop.xlane.xlu0 %926  ;;  %2264 = vmatprep.mubr.f32.mxu1 %v2125_v4  ;;  %v1724_v19 = vrot.slane %v1023_v14, %v3636_v6 }
 0x1ee   : > { %v1565_v62 = vrot.slane %v927_v18, %v3636_v6 }
 0x1ef   : > { %v1725_v32 = vsel %vm1566_vm15, %v1724_v19, %v1720_v7 }
 0x1f0   : > { %v1215_v21 = vpop.xlane.xlu1 %1214  ;;  %v1567_v29 = vsel %vm1566_vm15, %v1565_v62, %v1560_v57 }
 0x1f1   : > { %v1119_v22 = vpop.xlane.xlu0 %1118  ;;  %v2040_v24 = vrot.slane %v1215_v21, %v3636_v6 }
 0x1f2   : > { %v1882_v26 = vrot.slane %v1119_v22, %v3636_v6 }
 0x1f3   : > { %v2041_v33 = vsel %vm1566_vm15, %v2040_v24, %v2036_v31 }
 0x1f4   : > { %v1883_v28 = vsel %vm1566_vm15, %v1882_v26, %v1878_v17  ;;  %v2124_v6 = vsel %vm2121_vm0, %v2041_v33, %v1725_v32 }
 0x1f5   : > { %v2122_v34 = vsel %vm2121_vm0, %v1883_v28, %v1567_v29  ;;  %2265 = vmatmul.mubr.f32.vlgmr.msra.gmra.mrb[0].mxu1 %v2124_v6 }
 0x1f6   : > { %2195 = vmatmul.mubr.f32.vlgmr.msra.gmra.mrb[0].mxu0 %v2122_v34 }
 0x2c8   : > { %v2451_v39 = vpop.f32.mrb[0].mxu1 }
 0x2c9   : > { %v2416_v38 = vpop.f32.mrb[0].mxu0  ;;  %v2452_v60 = vpop.f32.mrb[1].mxu1 }
 0x2ca   : > { %v2417_v41 = vpop.f32.mrb[1].mxu0  ;;  %v2453_v44 = vadd.f32 %v2452_v60, %v2451_v39 }
 0x2cb   : > { %v2418_v43 = vadd.f32 %v2417_v41, %v2416_v38  ;;  %2275 = sbr.rel (%p2377_p11) target bundleno = 732 (0x2dc), region = 78 }
 0x2cd   : > { %v2267_v15 = vadd.f32 %v2453_v44, %v2418_v43 }
 0x2cf   : > { %v2270_v46 = vadd.f32 %v2267_v15, %v1264_v11 }
 0x2d1   : > { %2271 = vst [vmem:[#allocation2] sm:$0x3] %v2270_v46 }
 0x2d8   : > { %v2276_v50 = vld [vmem:[#allocation2] sm:$0x3] }
 0x2d9   : > { %v2284_v51 = vadd.f32 %v2378_v55, %v2276_v50 }
 0x2db   : > { %2285 = vst [vmem:[#allocation4] sm:$0x3] %v2284_v51 }
 0x2dc PF: > { %p3753_p12 = scmp.eq.s32.totalorder %s2366_s17, 3  ;;  %s2637_s19 = smov [#allocation4]  }
 0x2dd   : > { %s2295_s20 = sshll.u32 %s2637_s19, 4  ;;  %s2296_s20 = int_to_ptr.vmem [resolvable:$true] %s2295_s20 }
 0x2de   : > { %s2566_s14 = scalar_lea.vmem %s2296_s20, 32  ;;  %p2573_p2 = scmp.lt.s32.totalorder %s2296_s20, %s2296_s20 }
 0x2df   : > { %p2567_p13 = scmp.ne.s32.totalorder %s2296_s20, %s2566_s14  ;;  %p2574_p3 = scmp.lt.s32.totalorder %s2566_s14, %s2566_s14 }
 0x2e1   : > { %p2568_p0 = pnand %p2567_p13, %p3753_p12  ;;  %p2575_p4 = por %p2574_p3, %p2573_p2 }
 0x2e3   : > { %p2569_p1 = pneg %p2568_p0 }
 0x2e5   : > { %p2576_p5 = pnand %p2575_p4, %p2569_p1 }
 0x2e7   : > { %2579 = shalt.err (!%p2576_p5)
}
 0x2e8   : > { %s2580_s17 = scalar_lea.hbm %s3797_s3, 32 }
 0x2e9   : > { %p2581_p6 = scmp.ne.s32.totalorder %s3797_s3, %s2580_s17  ;;  %p2586_p9 = scmp.lt.u32.totalorder %s2580_s17, %s3797_s3 }
 0x2eb   : > { %p2582_p7 = pnand %p2581_p6, %p3753_p12 }
 0x2ed   : > { %p2583_p8 = pneg %p2582_p7 }
 0x2ef   : > { %p2588_p10 = pnand %p2586_p9, %p2583_p8 }
 0x2f1   : > { %2591 = shalt.err (!%p2588_p10)
}
 0x2f2   : > { %2519 = dma.vmem_to_hbm [thread:$0]  (%p3753_p12), %s2296_s20, 32, %s3797_s3, [#allocation5]  }
 0x2f3   : > { %2613 = dma.done.wait (%p3753_p12), [#allocation5], 32  }
 0x2f4   : > { %2615 = vsyncadd (%p3753_p12), [#allocation5], 4294967264 }
 0x2f5 PF: > { %s14_s16 = sadd.s32 1, %s2634_s16   ;;  %s3799_s12 = smov %s2622_s13 }
 0x2f6   : > { %p11_p11 = scmp.ge.s32.totalorder %s14_s16, 6   ;;  %s3800_s13 = smov %s2694_s21 }
 0x2f7   : > { %s3801_s14 = smov %s2630_s15  ;;  %s3802_s15 = smov %s3804_s18 }
 0x2f8   :  { %13 = sbr.rel (!%p11_p11) target bundleno = 3 (0x3), region = 114 }
 0x2ff   :  { %2308 = vsyncpa [#allocation5], 1 }
 0x300   :  { %2310 = vsyncpa [#allocation5 + $0x1], 1 }

</bundles_post_ra>
